<compile_context>
chip_gen: v7x
topology: tpu7x:2x2x1
jax: 0.10.0
libtpu: 0.0.40
codegen_flags: <defaults>
</compile_context>

<pallas_src>
import math
from functools import partial

import jax
import jax.numpy as jnp
from jax.experimental import pallas as pl


# -----------------------------------------------------------------------------
# Fused Pallas kernel factory: all LSTM layers + FC epilogue, register-resident
# -----------------------------------------------------------------------------
def _make_kernel(L, S, B, H):
    """Build the fused SQA-LSTM kernel specialized on (L, S, B, H)."""

    def kernel(*refs):
        if L > 1:
            (x_ref, q_ref, a_ref, wih0_ref, wih_rest_ref, whh_ref,
             wqh_ref, wah_ref, bias_ref, fcw_ref, fcb_ref, out_ref) = refs
        else:
            (x_ref, q_ref, a_ref, wih0_ref, whh_ref,
             wqh_ref, wah_ref, bias_ref, fcw_ref, fcb_ref, out_ref) = refs
            wih_rest_ref = None

        q0 = q_ref[...]                      # (B, Q)
        a0 = a_ref[...]                      # (B, A)
        seq = x_ref[...]                     # (S*B, In)  time-major layer input

        for l in range(L):                   # static (trace-time) layer loop
            # Hoisted input-side matmul over the whole sequence (one MXU call).
            wih = wih0_ref[...] if l == 0 else wih_rest_ref[l - 1]
            gx = jnp.dot(seq, wih, preferred_element_type=jnp.float32)  # (S*B,4H)

            # Constant-over-time q/a projection + all four biases, folded into
            # the pre-activations ONCE per layer (off the serial chain).
            qa = (jnp.dot(q0, wqh_ref[l], preferred_element_type=jnp.float32)
                  + jnp.dot(a0, wah_ref[l], preferred_element_type=jnp.float32)
                  + bias_ref[l])                                        # (B, 4H)
            gx = gx + jnp.concatenate([qa] * S, axis=0)                 # (S*B,4H)

            whh_l = whh_ref[l]                                          # (H, 4H)
            h = jnp.zeros((B, H), jnp.float32)   # init_states is None -> zeros
            c = jnp.zeros((B, H), jnp.float32)
            hs = []

            # Serial recurrence, fully unrolled; per step only one (B,H)@(H,4H)
            # MXU dot + VPU/EUP gate math on register-resident values.
            for t in range(S):
                gates = (gx[t * B:(t + 1) * B, :]
                         + jnp.dot(h, whh_l, preferred_element_type=jnp.float32))
                i_g = jax.nn.sigmoid(gates[:, 0 * H:1 * H])
                f_g = jax.nn.sigmoid(gates[:, 1 * H:2 * H])
                g_g = jnp.tanh(gates[:, 2 * H:3 * H])
                o_g = jax.nn.sigmoid(gates[:, 3 * H:4 * H])
                c = f_g * c + i_g * g_g
                h = o_g * jnp.tanh(c)
                hs.append(h)

            seq = jnp.concatenate(hs, axis=0)    # (S*B, H) register/VMEM-resident

        # Fused FC epilogue over all time steps at once.
        out_ref[...] = (jnp.dot(seq, fcw_ref[...],
                                preferred_element_type=jnp.float32)
                        + fcb_ref[...])

    return kernel


# -----------------------------------------------------------------------------
# Parameter init (mirrors nn.init.uniform_(-stdv, stdv) of the PyTorch module)
# -----------------------------------------------------------------------------
def init_params(key, question_size, answer_size, input_size, hidden_size,
                num_layers, output_size):
    stdv = 1.0 / math.sqrt(hidden_size)
    params = {"layers": []}
    for layer in range(num_layers):
        in_sz = input_size if layer == 0 else hidden_size
        keys = jax.random.split(jax.random.fold_in(key, layer), 8)
        u = lambda k, shape: jax.random.uniform(
            k, shape, jnp.float32, minval=-stdv, maxval=stdv)
        params["layers"].append({
            "w_qh": u(keys[0], (question_size, 4 * hidden_size)),
            "w_ah": u(keys[1], (answer_size, 4 * hidden_size)),
            "w_ih": u(keys[2], (in_sz, 4 * hidden_size)),
            "w_hh": u(keys[3], (hidden_size, 4 * hidden_size)),
            "b_qh": u(keys[4], (4 * hidden_size,)),
            "b_ah": u(keys[5], (4 * hidden_size,)),
            "b_ih": u(keys[6], (4 * hidden_size,)),
            "b_hh": u(keys[7], (4 * hidden_size,)),
        })
    kf = jax.random.split(jax.random.fold_in(key, 1000), 2)
    fb = 1.0 / math.sqrt(hidden_size)
    params["fc_w"] = jax.random.uniform(
        kf[0], (hidden_size, output_size), jnp.float32, minval=-fb, maxval=fb)
    params["fc_b"] = jax.random.uniform(
        kf[1], (output_size,), jnp.float32, minval=-fb, maxval=fb)
    return params


# -----------------------------------------------------------------------------
# One-time parameter packing (peephole zeroing + bias summing + layer stacking)
# -----------------------------------------------------------------------------
def pack_params(params, is_peephole):
    layers = params["layers"]
    L = len(layers)
    H = layers[0]["w_hh"].shape[0]

    def zero_gate_w(w):   # zero the "cell" gate columns if peephole
        return w.at[:, 2 * H:3 * H].set(0.0) if is_peephole else w

    def zero_gate_b(b):
        return b.at[2 * H:3 * H].set(0.0) if is_peephole else b

    packed = {
        "wih0": layers[0]["w_ih"],                                    # (In, 4H)
        "whh": jnp.stack([l["w_hh"] for l in layers], axis=0),        # (L, H, 4H)
        "wqh": jnp.stack([zero_gate_w(l["w_qh"]) for l in layers]),   # (L, Q, 4H)
        "wah": jnp.stack([zero_gate_w(l["w_ah"]) for l in layers]),   # (L, A, 4H)
        "bias": jnp.stack([(zero_gate_b(l["b_qh"]) + zero_gate_b(l["b_ah"])
                            + l["b_ih"] + l["b_hh"]).reshape(1, 4 * H)
                           for l in layers]),                         # (L, 1, 4H)
        "fc_w": params["fc_w"],                                       # (H, O)
        "fc_b": params["fc_b"].reshape(1, -1),                        # (1, O)
    }
    if L > 1:
        packed["wih_rest"] = jnp.stack(
            [layers[k]["w_ih"] for k in range(1, L)], axis=0)         # (L-1, H, 4H)
    return packed


# -----------------------------------------------------------------------------
# Model wrapper: one fused pallas_call, minimal surrounding XLA ops
# -----------------------------------------------------------------------------
@jax.jit
def sqalstm_model_forward(packed, question, answer, x):
    """Equivalent of SQALSTMModel.forward.  Returns (B, S, output_size)."""
    B, S, In = x.shape
    L, H, _ = packed["whh"].shape
    O = packed["fc_w"].shape[1]

    q0 = question[:, 0, :]   # only time step 0 of question/answer is ever used
    a0 = answer[:, 0, :]
    x_tm = jnp.transpose(x, (1, 0, 2)).reshape(S * B, In)   # time-major flat

    inputs = [x_tm, q0, a0, packed["wih0"]]
    if L > 1:
        inputs.append(packed["wih_rest"])
    inputs += [packed["whh"], packed["wqh"], packed["wah"], packed["bias"],
               packed["fc_w"], packed["fc_b"]]

    out2d = pl.pallas_call(
        _make_kernel(L, S, B, H),
        out_shape=jax.ShapeDtypeStruct((S * B, O), jnp.float32),
    )(*inputs)

    # Only the tiny (S*B, O) FC result crosses back to batch-first layout.
    return out2d.reshape(S, B, O).transpose(1, 0, 2)


# -----------------------------------------------------------------------------
# Pure-JAX reference (mirrors the PyTorch code) for a correctness check
# -----------------------------------------------------------------------------
def reference_forward(params, question, answer, x, is_peephole=False):
    B, S, _ = x.shape
    H = params["layers"][0]["w_hh"].shape[0]
    q0 = question[:, 0, :]
    a0 = answer[:, 0, :]
    inputs = jnp.transpose(x, (1, 0, 2))
    for layer in params["layers"]:
        q_temp = q0 @ layer["w_qh"] + layer["b_qh"]
        a_temp = a0 @ layer["w_ah"] + layer["b_ah"]
        if is_peephole:
            q_temp = q_temp.at[:, 2 * H:3 * H].set(0.0)
            a_temp = a_temp.at[:, 2 * H:3 * H].set(0.0)
        h = jnp.zeros((B, H), jnp.float32)
        c = jnp.zeros((B, H), jnp.float32)
        hs = []
        for t in range(S):
            gates = (q_temp + a_temp + inputs[t] @ layer["w_ih"]
                     + layer["b_ih"] + h @ layer["w_hh"] + layer["b_hh"])
            ig, fg, gg, og = jnp.split(gates, 4, axis=1)
            c = jax.nn.sigmoid(fg) * c + jax.nn.sigmoid(ig) * jnp.tanh(gg)
            h = jax.nn.sigmoid(og) * jnp.tanh(c)
            hs.append(h)
        inputs = jnp.stack(hs, axis=0)
    out = jnp.transpose(inputs, (1, 0, 2))
    return out @ params["fc_w"] + params["fc_b"]


# -----------------------------------------------------------------------------
if __name__ == "__main__":
    QUESTION_SIZE = 8
    ANSWER_SIZE = 8
    INPUT_SIZE = 16
    HIDDEN_SIZE = 32
    NUM_LAYERS = 2
    OUTPUT_SIZE = 8
    B, S, SQ, SA = 2, 8, 3, 3

    key = jax.random.PRNGKey(0)
    kq, ka, kx, kp = jax.random.split(key, 4)
    question = jax.random.normal(kq, (B, SQ, QUESTION_SIZE), jnp.float32)
    answer = jax.random.normal(ka, (B, SA, ANSWER_SIZE), jnp.float32)
    x = jax.random.normal(kx, (B, S, INPUT_SIZE), jnp.float32)

    params = init_params(kp, QUESTION_SIZE, ANSWER_SIZE, INPUT_SIZE,
                         HIDDEN_SIZE, NUM_LAYERS, OUTPUT_SIZE)

    ok = True
    for is_peephole in (False, True):
        packed = pack_params(params, is_peephole)
        out = sqalstm_model_forward(packed, question, answer, x)
        out = jax.block_until_ready(out)
        ref = reference_forward(params, question, answer, x,
                                is_peephole=is_peephole)
        assert out.shape == (B, S, OUTPUT_SIZE), out.shape
        err = float(jnp.max(jnp.abs(out - ref)))
        assert jnp.allclose(out, ref, atol=1e-4, rtol=1e-4), (is_peephole, err)

    print("KERNEL_OK")
</pallas_src>

<mosaic_0001>
module attributes {stable_mosaic.version = 11 : i64} {
  func.func @kernel(%arg0: memref<16x16xf32, #tpu.memory_space<vmem>>, %arg1: memref<2x8xf32, #tpu.memory_space<vmem>>, %arg2: memref<2x8xf32, #tpu.memory_space<vmem>>, %arg3: memref<16x128xf32, #tpu.memory_space<vmem>>, %arg4: memref<1x32x128xf32, #tpu.memory_space<vmem>>, %arg5: memref<2x32x128xf32, #tpu.memory_space<vmem>>, %arg6: memref<2x8x128xf32, #tpu.memory_space<vmem>>, %arg7: memref<2x8x128xf32, #tpu.memory_space<vmem>>, %arg8: memref<2x1x128xf32, #tpu.memory_space<vmem>>, %arg9: memref<32x8xf32, #tpu.memory_space<vmem>>, %arg10: memref<1x8xf32, #tpu.memory_space<vmem>>, %arg11: memref<16x8xf32, #tpu.memory_space<vmem>>) attributes {dimension_semantics = [], scalar_prefetch = 0 : i64, scratch_operands = 0 : i64, tpu.core_type = #tpu.core_type<tc>} {
    %c0 = arith.constant 0 : index
    %c0_0 = arith.constant 0 : index
    %0 = vector.load %arg1[%c0, %c0_0] : memref<2x8xf32, #tpu.memory_space<vmem>>, vector<2x8xf32>
    %c0_1 = arith.constant 0 : index
    %c0_2 = arith.constant 0 : index
    %1 = vector.load %arg2[%c0_1, %c0_2] : memref<2x8xf32, #tpu.memory_space<vmem>>, vector<2x8xf32>
    %c0_3 = arith.constant 0 : index
    %c0_4 = arith.constant 0 : index
    %2 = vector.load %arg0[%c0_3, %c0_4] : memref<16x16xf32, #tpu.memory_space<vmem>>, vector<16x16xf32>
    %c0_5 = arith.constant 0 : index
    %c0_6 = arith.constant 0 : index
    %3 = vector.load %arg3[%c0_5, %c0_6] : memref<16x128xf32, #tpu.memory_space<vmem>>, vector<16x128xf32>
    %cst = arith.constant dense<0.000000e+00> : vector<16x128xf32>
    %4 = tpu.matmul %2, %3, %cst {dimension_numbers = #tpu.dot_dimension_numbers<[1], [0], [0], [1], [0, 0, 1, 1], [], []>} : vector<16x16xf32>, vector<16x128xf32>, vector<16x128xf32> -> vector<16x128xf32>
    %c0_7 = arith.constant 0 : index
    %c0_8 = arith.constant 0 : index
    %c0_9 = arith.constant 0 : index
    %5 = vector.load %arg6[%c0_7, %c0_8, %c0_9] : memref<2x8x128xf32, #tpu.memory_space<vmem>>, vector<1x8x128xf32>
    %6 = vector.shape_cast %5 : vector<1x8x128xf32> to vector<8x128xf32>
    %cst_10 = arith.constant dense<0.000000e+00> : vector<2x128xf32>
    %7 = tpu.matmul %0, %6, %cst_10 {dimension_numbers = #tpu.dot_dimension_numbers<[1], [0], [0], [1], [0, 0, 1, 1], [], []>} : vector<2x8xf32>, vector<8x128xf32>, vector<2x128xf32> -> vector<2x128xf32>
    %c0_11 = arith.constant 0 : index
    %c0_12 = arith.constant 0 : index
    %c0_13 = arith.constant 0 : index
    %8 = vector.load %arg7[%c0_11, %c0_12, %c0_13] : memref<2x8x128xf32, #tpu.memory_space<vmem>>, vector<1x8x128xf32>
    %9 = vector.shape_cast %8 : vector<1x8x128xf32> to vector<8x128xf32>
    %cst_14 = arith.constant dense<0.000000e+00> : vector<2x128xf32>
    %10 = tpu.matmul %1, %9, %cst_14 {dimension_numbers = #tpu.dot_dimension_numbers<[1], [0], [0], [1], [0, 0, 1, 1], [], []>} : vector<2x8xf32>, vector<8x128xf32>, vector<2x128xf32> -> vector<2x128xf32>
    %11 = arith.addf %7, %10 : vector<2x128xf32>
    %c0_15 = arith.constant 0 : index
    %c0_16 = arith.constant 0 : index
    %c0_17 = arith.constant 0 : index
    %12 = vector.load %arg8[%c0_15, %c0_16, %c0_17] : memref<2x1x128xf32, #tpu.memory_space<vmem>>, vector<1x1x128xf32>
    %13 = vector.shape_cast %12 : vector<1x1x128xf32> to vector<1x128xf32>
    %14 = vector.broadcast %13 : vector<1x128xf32> to vector<2x128xf32>
    %15 = arith.addf %11, %14 : vector<2x128xf32>
    %16 = tpu.concatenate %15, %15, %15, %15, %15, %15, %15, %15 in 0 : vector<2x128xf32>, vector<2x128xf32>, vector<2x128xf32>, vector<2x128xf32>, vector<2x128xf32>, vector<2x128xf32>, vector<2x128xf32>, vector<2x128xf32> -> vector<16x128xf32>
    %17 = arith.addf %4, %16 : vector<16x128xf32>
    %c0_18 = arith.constant 0 : index
    %c0_19 = arith.constant 0 : index
    %c0_20 = arith.constant 0 : index
    %18 = vector.load %arg5[%c0_18, %c0_19, %c0_20] : memref<2x32x128xf32, #tpu.memory_space<vmem>>, vector<1x32x128xf32>
    %19 = vector.shape_cast %18 : vector<1x32x128xf32> to vector<32x128xf32>
    %cst_21 = arith.constant 0.000000e+00 : f32
    %20 = vector.broadcast %cst_21 : f32 to vector<2x32xf32>
    %cst_22 = arith.constant 0.000000e+00 : f32
    %21 = vector.broadcast %cst_22 : f32 to vector<2x32xf32>
    %22 = vector.extract_strided_slice %17 {offsets = [0, 0], sizes = [2, 128], strides = [1, 1]} : vector<16x128xf32> to vector<2x128xf32>
    %cst_23 = arith.constant dense<0.000000e+00> : vector<2x128xf32>
    %23 = tpu.matmul %20, %19, %cst_23 {dimension_numbers = #tpu.dot_dimension_numbers<[1], [0], [0], [1], [0, 0, 1, 1], [], []>} : vector<2x32xf32>, vector<32x128xf32>, vector<2x128xf32> -> vector<2x128xf32>
    %24 = arith.addf %22, %23 : vector<2x128xf32>
    %25 = vector.extract_strided_slice %24 {offsets = [0, 0], sizes = [2, 32], strides = [1, 1]} : vector<2x128xf32> to vector<2x32xf32>
    %26 = arith.negf %25 : vector<2x32xf32>
    %27 = math.exp %26 : vector<2x32xf32>
    %cst_24 = arith.constant 1.000000e+00 : f32
    %28 = vector.broadcast %cst_24 : f32 to vector<2x32xf32>
    %29 = arith.addf %28, %27 : vector<2x32xf32>
    %30 = arith.divf %28, %29 : vector<2x32xf32>
    %31 = vector.extract_strided_slice %24 {offsets = [0, 32], sizes = [2, 32], strides = [1, 1]} : vector<2x128xf32> to vector<2x32xf32>
    %32 = arith.negf %31 : vector<2x32xf32>
    %33 = math.exp %32 : vector<2x32xf32>
    %cst_25 = arith.constant 1.000000e+00 : f32
    %34 = vector.broadcast %cst_25 : f32 to vector<2x32xf32>
    %35 = arith.addf %34, %33 : vector<2x32xf32>
    %36 = arith.divf %34, %35 : vector<2x32xf32>
    %37 = vector.extract_strided_slice %24 {offsets = [0, 64], sizes = [2, 32], strides = [1, 1]} : vector<2x128xf32> to vector<2x32xf32>
    %38 = math.tanh %37 : vector<2x32xf32>
    %39 = vector.extract_strided_slice %24 {offsets = [0, 96], sizes = [2, 32], strides = [1, 1]} : vector<2x128xf32> to vector<2x32xf32>
    %40 = arith.negf %39 : vector<2x32xf32>
    %41 = math.exp %40 : vector<2x32xf32>
    %cst_26 = arith.constant 1.000000e+00 : f32
    %42 = vector.broadcast %cst_26 : f32 to vector<2x32xf32>
    %43 = arith.addf %42, %41 : vector<2x32xf32>
    %44 = arith.divf %42, %43 : vector<2x32xf32>
    %45 = arith.mulf %36, %21 : vector<2x32xf32>
    %46 = arith.mulf %30, %38 : vector<2x32xf32>
    %47 = arith.addf %45, %46 : vector<2x32xf32>
    %48 = math.tanh %47 : vector<2x32xf32>
    %49 = arith.mulf %44, %48 : vector<2x32xf32>
    %50 = vector.extract_strided_slice %17 {offsets = [2, 0], sizes = [2, 128], strides = [1, 1]} : vector<16x128xf32> to vector<2x128xf32>
    %cst_27 = arith.constant dense<0.000000e+00> : vector<2x128xf32>
    %51 = tpu.matmul %49, %19, %cst_27 {dimension_numbers = #tpu.dot_dimension_numbers<[1], [0], [0], [1], [0, 0, 1, 1], [], []>} : vector<2x32xf32>, vector<32x128xf32>, vector<2x128xf32> -> vector<2x128xf32>
    %52 = arith.addf %50, %51 : vector<2x128xf32>
    %53 = vector.extract_strided_slice %52 {offsets = [0, 0], sizes = [2, 32], strides = [1, 1]} : vector<2x128xf32> to vector<2x32xf32>
    %54 = arith.negf %53 : vector<2x32xf32>
    %55 = math.exp %54 : vector<2x32xf32>
    %cst_28 = arith.constant 1.000000e+00 : f32
    %56 = vector.broadcast %cst_28 : f32 to vector<2x32xf32>
    %57 = arith.addf %56, %55 : vector<2x32xf32>
    %58 = arith.divf %56, %57 : vector<2x32xf32>
    %59 = vector.extract_strided_slice %52 {offsets = [0, 32], sizes = [2, 32], strides = [1, 1]} : vector<2x128xf32> to vector<2x32xf32>
    %60 = arith.negf %59 : vector<2x32xf32>
    %61 = math.exp %60 : vector<2x32xf32>
    %cst_29 = arith.constant 1.000000e+00 : f32
    %62 = vector.broadcast %cst_29 : f32 to vector<2x32xf32>
    %63 = arith.addf %62, %61 : vector<2x32xf32>
    %64 = arith.divf %62, %63 : vector<2x32xf32>
    %65 = vector.extract_strided_slice %52 {offsets = [0, 64], sizes = [2, 32], strides = [1, 1]} : vector<2x128xf32> to vector<2x32xf32>
    %66 = math.tanh %65 : vector<2x32xf32>
    %67 = vector.extract_strided_slice %52 {offsets = [0, 96], sizes = [2, 32], strides = [1, 1]} : vector<2x128xf32> to vector<2x32xf32>
    %68 = arith.negf %67 : vector<2x32xf32>
    %69 = math.exp %68 : vector<2x32xf32>
    %cst_30 = arith.constant 1.000000e+00 : f32
    %70 = vector.broadcast %cst_30 : f32 to vector<2x32xf32>
    %71 = arith.addf %70, %69 : vector<2x32xf32>
    %72 = arith.divf %70, %71 : vector<2x32xf32>
    %73 = arith.mulf %64, %47 : vector<2x32xf32>
    %74 = arith.mulf %58, %66 : vector<2x32xf32>
    %75 = arith.addf %73, %74 : vector<2x32xf32>
    %76 = math.tanh %75 : vector<2x32xf32>
    %77 = arith.mulf %72, %76 : vector<2x32xf32>
    %78 = vector.extract_strided_slice %17 {offsets = [4, 0], sizes = [2, 128], strides = [1, 1]} : vector<16x128xf32> to vector<2x128xf32>
    %cst_31 = arith.constant dense<0.000000e+00> : vector<2x128xf32>
    %79 = tpu.matmul %77, %19, %cst_31 {dimension_numbers = #tpu.dot_dimension_numbers<[1], [0], [0], [1], [0, 0, 1, 1], [], []>} : vector<2x32xf32>, vector<32x128xf32>, vector<2x128xf32> -> vector<2x128xf32>
    %80 = arith.addf %78, %79 : vector<2x128xf32>
    %81 = vector.extract_strided_slice %80 {offsets = [0, 0], sizes = [2, 32], strides = [1, 1]} : vector<2x128xf32> to vector<2x32xf32>
    %82 = arith.negf %81 : vector<2x32xf32>
    %83 = math.exp %82 : vector<2x32xf32>
    %cst_32 = arith.constant 1.000000e+00 : f32
    %84 = vector.broadcast %cst_32 : f32 to vector<2x32xf32>
    %85 = arith.addf %84, %83 : vector<2x32xf32>
    %86 = arith.divf %84, %85 : vector<2x32xf32>
    %87 = vector.extract_strided_slice %80 {offsets = [0, 32], sizes = [2, 32], strides = [1, 1]} : vector<2x128xf32> to vector<2x32xf32>
    %88 = arith.negf %87 : vector<2x32xf32>
    %89 = math.exp %88 : vector<2x32xf32>
    %cst_33 = arith.constant 1.000000e+00 : f32
    %90 = vector.broadcast %cst_33 : f32 to vector<2x32xf32>
    %91 = arith.addf %90, %89 : vector<2x32xf32>
    %92 = arith.divf %90, %91 : vector<2x32xf32>
    %93 = vector.extract_strided_slice %80 {offsets = [0, 64], sizes = [2, 32], strides = [1, 1]} : vector<2x128xf32> to vector<2x32xf32>
    %94 = math.tanh %93 : vector<2x32xf32>
    %95 = vector.extract_strided_slice %80 {offsets = [0, 96], sizes = [2, 32], strides = [1, 1]} : vector<2x128xf32> to vector<2x32xf32>
    %96 = arith.negf %95 : vector<2x32xf32>
    %97 = math.exp %96 : vector<2x32xf32>
    %cst_34 = arith.constant 1.000000e+00 : f32
    %98 = vector.broadcast %cst_34 : f32 to vector<2x32xf32>
    %99 = arith.addf %98, %97 : vector<2x32xf32>
    %100 = arith.divf %98, %99 : vector<2x32xf32>
    %101 = arith.mulf %92, %75 : vector<2x32xf32>
    %102 = arith.mulf %86, %94 : vector<2x32xf32>
    %103 = arith.addf %101, %102 : vector<2x32xf32>
    %104 = math.tanh %103 : vector<2x32xf32>
    %105 = arith.mulf %100, %104 : vector<2x32xf32>
    %106 = vector.extract_strided_slice %17 {offsets = [6, 0], sizes = [2, 128], strides = [1, 1]} : vector<16x128xf32> to vector<2x128xf32>
    %cst_35 = arith.constant dense<0.000000e+00> : vector<2x128xf32>
    %107 = tpu.matmul %105, %19, %cst_35 {dimension_numbers = #tpu.dot_dimension_numbers<[1], [0], [0], [1], [0, 0, 1, 1], [], []>} : vector<2x32xf32>, vector<32x128xf32>, vector<2x128xf32> -> vector<2x128xf32>
    %108 = arith.addf %106, %107 : vector<2x128xf32>
    %109 = vector.extract_strided_slice %108 {offsets = [0, 0], sizes = [2, 32], strides = [1, 1]} : vector<2x128xf32> to vector<2x32xf32>
    %110 = arith.negf %109 : vector<2x32xf32>
    %111 = math.exp %110 : vector<2x32xf32>
    %cst_36 = arith.constant 1.000000e+00 : f32
    %112 = vector.broadcast %cst_36 : f32 to vector<2x32xf32>
    %113 = arith.addf %112, %111 : vector<2x32xf32>
    %114 = arith.divf %112, %113 : vector<2x32xf32>
    %115 = vector.extract_strided_slice %108 {offsets = [0, 32], sizes = [2, 32], strides = [1, 1]} : vector<2x128xf32> to vector<2x32xf32>
    %116 = arith.negf %115 : vector<2x32xf32>
    %117 = math.exp %116 : vector<2x32xf32>
    %cst_37 = arith.constant 1.000000e+00 : f32
    %118 = vector.broadcast %cst_37 : f32 to vector<2x32xf32>
    %119 = arith.addf %118, %117 : vector<2x32xf32>
    %120 = arith.divf %118, %119 : vector<2x32xf32>
    %121 = vector.extract_strided_slice %108 {offsets = [0, 64], sizes = [2, 32], strides = [1, 1]} : vector<2x128xf32> to vector<2x32xf32>
    %122 = math.tanh %121 : vector<2x32xf32>
    %123 = vector.extract_strided_slice %108 {offsets = [0, 96], sizes = [2, 32], strides = [1, 1]} : vector<2x128xf32> to vector<2x32xf32>
    %124 = arith.negf %123 : vector<2x32xf32>
    %125 = math.exp %124 : vector<2x32xf32>
    %cst_38 = arith.constant 1.000000e+00 : f32
    %126 = vector.broadcast %cst_38 : f32 to vector<2x32xf32>
    %127 = arith.addf %126, %125 : vector<2x32xf32>
    %128 = arith.divf %126, %127 : vector<2x32xf32>
    %129 = arith.mulf %120, %103 : vector<2x32xf32>
    %130 = arith.mulf %114, %122 : vector<2x32xf32>
    %131 = arith.addf %129, %130 : vector<2x32xf32>
    %132 = math.tanh %131 : vector<2x32xf32>
    %133 = arith.mulf %128, %132 : vector<2x32xf32>
    %134 = vector.extract_strided_slice %17 {offsets = [8, 0], sizes = [2, 128], strides = [1, 1]} : vector<16x128xf32> to vector<2x128xf32>
    %cst_39 = arith.constant dense<0.000000e+00> : vector<2x128xf32>
    %135 = tpu.matmul %133, %19, %cst_39 {dimension_numbers = #tpu.dot_dimension_numbers<[1], [0], [0], [1], [0, 0, 1, 1], [], []>} : vector<2x32xf32>, vector<32x128xf32>, vector<2x128xf32> -> vector<2x128xf32>
    %136 = arith.addf %134, %135 : vector<2x128xf32>
    %137 = vector.extract_strided_slice %136 {offsets = [0, 0], sizes = [2, 32], strides = [1, 1]} : vector<2x128xf32> to vector<2x32xf32>
    %138 = arith.negf %137 : vector<2x32xf32>
    %139 = math.exp %138 : vector<2x32xf32>
    %cst_40 = arith.constant 1.000000e+00 : f32
    %140 = vector.broadcast %cst_40 : f32 to vector<2x32xf32>
    %141 = arith.addf %140, %139 : vector<2x32xf32>
    %142 = arith.divf %140, %141 : vector<2x32xf32>
    %143 = vector.extract_strided_slice %136 {offsets = [0, 32], sizes = [2, 32], strides = [1, 1]} : vector<2x128xf32> to vector<2x32xf32>
    %144 = arith.negf %143 : vector<2x32xf32>
    %145 = math.exp %144 : vector<2x32xf32>
    %cst_41 = arith.constant 1.000000e+00 : f32
    %146 = vector.broadcast %cst_41 : f32 to vector<2x32xf32>
    %147 = arith.addf %146, %145 : vector<2x32xf32>
    %148 = arith.divf %146, %147 : vector<2x32xf32>
    %149 = vector.extract_strided_slice %136 {offsets = [0, 64], sizes = [2, 32], strides = [1, 1]} : vector<2x128xf32> to vector<2x32xf32>
    %150 = math.tanh %149 : vector<2x32xf32>
    %151 = vector.extract_strided_slice %136 {offsets = [0, 96], sizes = [2, 32], strides = [1, 1]} : vector<2x128xf32> to vector<2x32xf32>
    %152 = arith.negf %151 : vector<2x32xf32>
    %153 = math.exp %152 : vector<2x32xf32>
    %cst_42 = arith.constant 1.000000e+00 : f32
    %154 = vector.broadcast %cst_42 : f32 to vector<2x32xf32>
    %155 = arith.addf %154, %153 : vector<2x32xf32>
    %156 = arith.divf %154, %155 : vector<2x32xf32>
    %157 = arith.mulf %148, %131 : vector<2x32xf32>
    %158 = arith.mulf %142, %150 : vector<2x32xf32>
    %159 = arith.addf %157, %158 : vector<2x32xf32>
    %160 = math.tanh %159 : vector<2x32xf32>
    %161 = arith.mulf %156, %160 : vector<2x32xf32>
    %162 = vector.extract_strided_slice %17 {offsets = [10, 0], sizes = [2, 128], strides = [1, 1]} : vector<16x128xf32> to vector<2x128xf32>
    %cst_43 = arith.constant dense<0.000000e+00> : vector<2x128xf32>
    %163 = tpu.matmul %161, %19, %cst_43 {dimension_numbers = #tpu.dot_dimension_numbers<[1], [0], [0], [1], [0, 0, 1, 1], [], []>} : vector<2x32xf32>, vector<32x128xf32>, vector<2x128xf32> -> vector<2x128xf32>
    %164 = arith.addf %162, %163 : vector<2x128xf32>
    %165 = vector.extract_strided_slice %164 {offsets = [0, 0], sizes = [2, 32], strides = [1, 1]} : vector<2x128xf32> to vector<2x32xf32>
    %166 = arith.negf %165 : vector<2x32xf32>
    %167 = math.exp %166 : vector<2x32xf32>
    %cst_44 = arith.constant 1.000000e+00 : f32
    %168 = vector.broadcast %cst_44 : f32 to vector<2x32xf32>
    %169 = arith.addf %168, %167 : vector<2x32xf32>
    %170 = arith.divf %168, %169 : vector<2x32xf32>
    %171 = vector.extract_strided_slice %164 {offsets = [0, 32], sizes = [2, 32], strides = [1, 1]} : vector<2x128xf32> to vector<2x32xf32>
    %172 = arith.negf %171 : vector<2x32xf32>
    %173 = math.exp %172 : vector<2x32xf32>
    %cst_45 = arith.constant 1.000000e+00 : f32
    %174 = vector.broadcast %cst_45 : f32 to vector<2x32xf32>
    %175 = arith.addf %174, %173 : vector<2x32xf32>
    %176 = arith.divf %174, %175 : vector<2x32xf32>
    %177 = vector.extract_strided_slice %164 {offsets = [0, 64], sizes = [2, 32], strides = [1, 1]} : vector<2x128xf32> to vector<2x32xf32>
    %178 = math.tanh %177 : vector<2x32xf32>
    %179 = vector.extract_strided_slice %164 {offsets = [0, 96], sizes = [2, 32], strides = [1, 1]} : vector<2x128xf32> to vector<2x32xf32>
    %180 = arith.negf %179 : vector<2x32xf32>
    %181 = math.exp %180 : vector<2x32xf32>
    %cst_46 = arith.constant 1.000000e+00 : f32
    %182 = vector.broadcast %cst_46 : f32 to vector<2x32xf32>
    %183 = arith.addf %182, %181 : vector<2x32xf32>
    %184 = arith.divf %182, %183 : vector<2x32xf32>
    %185 = arith.mulf %176, %159 : vector<2x32xf32>
    %186 = arith.mulf %170, %178 : vector<2x32xf32>
    %187 = arith.addf %185, %186 : vector<2x32xf32>
    %188 = math.tanh %187 : vector<2x32xf32>
    %189 = arith.mulf %184, %188 : vector<2x32xf32>
    %190 = vector.extract_strided_slice %17 {offsets = [12, 0], sizes = [2, 128], strides = [1, 1]} : vector<16x128xf32> to vector<2x128xf32>
    %cst_47 = arith.constant dense<0.000000e+00> : vector<2x128xf32>
    %191 = tpu.matmul %189, %19, %cst_47 {dimension_numbers = #tpu.dot_dimension_numbers<[1], [0], [0], [1], [0, 0, 1, 1], [], []>} : vector<2x32xf32>, vector<32x128xf32>, vector<2x128xf32> -> vector<2x128xf32>
    %192 = arith.addf %190, %191 : vector<2x128xf32>
    %193 = vector.extract_strided_slice %192 {offsets = [0, 0], sizes = [2, 32], strides = [1, 1]} : vector<2x128xf32> to vector<2x32xf32>
    %194 = arith.negf %193 : vector<2x32xf32>
    %195 = math.exp %194 : vector<2x32xf32>
    %cst_48 = arith.constant 1.000000e+00 : f32
    %196 = vector.broadcast %cst_48 : f32 to vector<2x32xf32>
    %197 = arith.addf %196, %195 : vector<2x32xf32>
    %198 = arith.divf %196, %197 : vector<2x32xf32>
    %199 = vector.extract_strided_slice %192 {offsets = [0, 32], sizes = [2, 32], strides = [1, 1]} : vector<2x128xf32> to vector<2x32xf32>
    %200 = arith.negf %199 : vector<2x32xf32>
    %201 = math.exp %200 : vector<2x32xf32>
    %cst_49 = arith.constant 1.000000e+00 : f32
    %202 = vector.broadcast %cst_49 : f32 to vector<2x32xf32>
    %203 = arith.addf %202, %201 : vector<2x32xf32>
    %204 = arith.divf %202, %203 : vector<2x32xf32>
    %205 = vector.extract_strided_slice %192 {offsets = [0, 64], sizes = [2, 32], strides = [1, 1]} : vector<2x128xf32> to vector<2x32xf32>
    %206 = math.tanh %205 : vector<2x32xf32>
    %207 = vector.extract_strided_slice %192 {offsets = [0, 96], sizes = [2, 32], strides = [1, 1]} : vector<2x128xf32> to vector<2x32xf32>
    %208 = arith.negf %207 : vector<2x32xf32>
    %209 = math.exp %208 : vector<2x32xf32>
    %cst_50 = arith.constant 1.000000e+00 : f32
    %210 = vector.broadcast %cst_50 : f32 to vector<2x32xf32>
    %211 = arith.addf %210, %209 : vector<2x32xf32>
    %212 = arith.divf %210, %211 : vector<2x32xf32>
    %213 = arith.mulf %204, %187 : vector<2x32xf32>
    %214 = arith.mulf %198, %206 : vector<2x32xf32>
    %215 = arith.addf %213, %214 : vector<2x32xf32>
    %216 = math.tanh %215 : vector<2x32xf32>
    %217 = arith.mulf %212, %216 : vector<2x32xf32>
    %218 = vector.extract_strided_slice %17 {offsets = [14, 0], sizes = [2, 128], strides = [1, 1]} : vector<16x128xf32> to vector<2x128xf32>
    %cst_51 = arith.constant dense<0.000000e+00> : vector<2x128xf32>
    %219 = tpu.matmul %217, %19, %cst_51 {dimension_numbers = #tpu.dot_dimension_numbers<[1], [0], [0], [1], [0, 0, 1, 1], [], []>} : vector<2x32xf32>, vector<32x128xf32>, vector<2x128xf32> -> vector<2x128xf32>
    %220 = arith.addf %218, %219 : vector<2x128xf32>
    %221 = vector.extract_strided_slice %220 {offsets = [0, 0], sizes = [2, 32], strides = [1, 1]} : vector<2x128xf32> to vector<2x32xf32>
    %222 = arith.negf %221 : vector<2x32xf32>
    %223 = math.exp %222 : vector<2x32xf32>
    %cst_52 = arith.constant 1.000000e+00 : f32
    %224 = vector.broadcast %cst_52 : f32 to vector<2x32xf32>
    %225 = arith.addf %224, %223 : vector<2x32xf32>
    %226 = arith.divf %224, %225 : vector<2x32xf32>
    %227 = vector.extract_strided_slice %220 {offsets = [0, 32], sizes = [2, 32], strides = [1, 1]} : vector<2x128xf32> to vector<2x32xf32>
    %228 = arith.negf %227 : vector<2x32xf32>
    %229 = math.exp %228 : vector<2x32xf32>
    %cst_53 = arith.constant 1.000000e+00 : f32
    %230 = vector.broadcast %cst_53 : f32 to vector<2x32xf32>
    %231 = arith.addf %230, %229 : vector<2x32xf32>
    %232 = arith.divf %230, %231 : vector<2x32xf32>
    %233 = vector.extract_strided_slice %220 {offsets = [0, 64], sizes = [2, 32], strides = [1, 1]} : vector<2x128xf32> to vector<2x32xf32>
    %234 = math.tanh %233 : vector<2x32xf32>
    %235 = vector.extract_strided_slice %220 {offsets = [0, 96], sizes = [2, 32], strides = [1, 1]} : vector<2x128xf32> to vector<2x32xf32>
    %236 = arith.negf %235 : vector<2x32xf32>
    %237 = math.exp %236 : vector<2x32xf32>
    %cst_54 = arith.constant 1.000000e+00 : f32
    %238 = vector.broadcast %cst_54 : f32 to vector<2x32xf32>
    %239 = arith.addf %238, %237 : vector<2x32xf32>
    %240 = arith.divf %238, %239 : vector<2x32xf32>
    %241 = arith.mulf %232, %215 : vector<2x32xf32>
    %242 = arith.mulf %226, %234 : vector<2x32xf32>
    %243 = arith.addf %241, %242 : vector<2x32xf32>
    %244 = math.tanh %243 : vector<2x32xf32>
    %245 = arith.mulf %240, %244 : vector<2x32xf32>
    %246 = tpu.concatenate %49, %77, %105, %133, %161, %189, %217, %245 in 0 : vector<2x32xf32>, vector<2x32xf32>, vector<2x32xf32>, vector<2x32xf32>, vector<2x32xf32>, vector<2x32xf32>, vector<2x32xf32>, vector<2x32xf32> -> vector<16x32xf32>
    %c0_55 = arith.constant 0 : index
    %c0_56 = arith.constant 0 : index
    %c0_57 = arith.constant 0 : index
    %247 = vector.load %arg4[%c0_55, %c0_56, %c0_57] : memref<1x32x128xf32, #tpu.memory_space<vmem>>, vector<1x32x128xf32>
    %248 = vector.shape_cast %247 : vector<1x32x128xf32> to vector<32x128xf32>
    %cst_58 = arith.constant dense<0.000000e+00> : vector<16x128xf32>
    %249 = tpu.matmul %246, %248, %cst_58 {dimension_numbers = #tpu.dot_dimension_numbers<[1], [0], [0], [1], [0, 0, 1, 1], [], []>} : vector<16x32xf32>, vector<32x128xf32>, vector<16x128xf32> -> vector<16x128xf32>
    %c1 = arith.constant 1 : index
    %c0_59 = arith.constant 0 : index
    %c0_60 = arith.constant 0 : index
    %250 = vector.load %arg6[%c1, %c0_59, %c0_60] : memref<2x8x128xf32, #tpu.memory_space<vmem>>, vector<1x8x128xf32>
    %251 = vector.shape_cast %250 : vector<1x8x128xf32> to vector<8x128xf32>
    %cst_61 = arith.constant dense<0.000000e+00> : vector<2x128xf32>
    %252 = tpu.matmul %0, %251, %cst_61 {dimension_numbers = #tpu.dot_dimension_numbers<[1], [0], [0], [1], [0, 0, 1, 1], [], []>} : vector<2x8xf32>, vector<8x128xf32>, vector<2x128xf32> -> vector<2x128xf32>
    %c1_62 = arith.constant 1 : index
    %c0_63 = arith.constant 0 : index
    %c0_64 = arith.constant 0 : index
    %253 = vector.load %arg7[%c1_62, %c0_63, %c0_64] : memref<2x8x128xf32, #tpu.memory_space<vmem>>, vector<1x8x128xf32>
    %254 = vector.shape_cast %253 : vector<1x8x128xf32> to vector<8x128xf32>
    %cst_65 = arith.constant dense<0.000000e+00> : vector<2x128xf32>
    %255 = tpu.matmul %1, %254, %cst_65 {dimension_numbers = #tpu.dot_dimension_numbers<[1], [0], [0], [1], [0, 0, 1, 1], [], []>} : vector<2x8xf32>, vector<8x128xf32>, vector<2x128xf32> -> vector<2x128xf32>
    %256 = arith.addf %252, %255 : vector<2x128xf32>
    %c1_66 = arith.constant 1 : index
    %c0_67 = arith.constant 0 : index
    %c0_68 = arith.constant 0 : index
    %257 = vector.load %arg8[%c1_66, %c0_67, %c0_68] : memref<2x1x128xf32, #tpu.memory_space<vmem>>, vector<1x1x128xf32>
    %258 = vector.shape_cast %257 : vector<1x1x128xf32> to vector<1x128xf32>
    %259 = vector.broadcast %258 : vector<1x128xf32> to vector<2x128xf32>
    %260 = arith.addf %256, %259 : vector<2x128xf32>
    %261 = tpu.concatenate %260, %260, %260, %260, %260, %260, %260, %260 in 0 : vector<2x128xf32>, vector<2x128xf32>, vector<2x128xf32>, vector<2x128xf32>, vector<2x128xf32>, vector<2x128xf32>, vector<2x128xf32>, vector<2x128xf32> -> vector<16x128xf32>
    %262 = arith.addf %249, %261 : vector<16x128xf32>
    %c1_69 = arith.constant 1 : index
    %c0_70 = arith.constant 0 : index
    %c0_71 = arith.constant 0 : index
    %263 = vector.load %arg5[%c1_69, %c0_70, %c0_71] : memref<2x32x128xf32, #tpu.memory_space<vmem>>, vector<1x32x128xf32>
    %264 = vector.shape_cast %263 : vector<1x32x128xf32> to vector<32x128xf32>
    %cst_72 = arith.constant 0.000000e+00 : f32
    %265 = vector.broadcast %cst_72 : f32 to vector<2x32xf32>
    %cst_73 = arith.constant 0.000000e+00 : f32
    %266 = vector.broadcast %cst_73 : f32 to vector<2x32xf32>
    %267 = vector.extract_strided_slice %262 {offsets = [0, 0], sizes = [2, 128], strides = [1, 1]} : vector<16x128xf32> to vector<2x128xf32>
    %cst_74 = arith.constant dense<0.000000e+00> : vector<2x128xf32>
    %268 = tpu.matmul %265, %264, %cst_74 {dimension_numbers = #tpu.dot_dimension_numbers<[1], [0], [0], [1], [0, 0, 1, 1], [], []>} : vector<2x32xf32>, vector<32x128xf32>, vector<2x128xf32> -> vector<2x128xf32>
    %269 = arith.addf %267, %268 : vector<2x128xf32>
    %270 = vector.extract_strided_slice %269 {offsets = [0, 0], sizes = [2, 32], strides = [1, 1]} : vector<2x128xf32> to vector<2x32xf32>
    %271 = arith.negf %270 : vector<2x32xf32>
    %272 = math.exp %271 : vector<2x32xf32>
    %cst_75 = arith.constant 1.000000e+00 : f32
    %273 = vector.broadcast %cst_75 : f32 to vector<2x32xf32>
    %274 = arith.addf %273, %272 : vector<2x32xf32>
    %275 = arith.divf %273, %274 : vector<2x32xf32>
    %276 = vector.extract_strided_slice %269 {offsets = [0, 32], sizes = [2, 32], strides = [1, 1]} : vector<2x128xf32> to vector<2x32xf32>
    %277 = arith.negf %276 : vector<2x32xf32>
    %278 = math.exp %277 : vector<2x32xf32>
    %cst_76 = arith.constant 1.000000e+00 : f32
    %279 = vector.broadcast %cst_76 : f32 to vector<2x32xf32>
    %280 = arith.addf %279, %278 : vector<2x32xf32>
    %281 = arith.divf %279, %280 : vector<2x32xf32>
    %282 = vector.extract_strided_slice %269 {offsets = [0, 64], sizes = [2, 32], strides = [1, 1]} : vector<2x128xf32> to vector<2x32xf32>
    %283 = math.tanh %282 : vector<2x32xf32>
    %284 = vector.extract_strided_slice %269 {offsets = [0, 96], sizes = [2, 32], strides = [1, 1]} : vector<2x128xf32> to vector<2x32xf32>
    %285 = arith.negf %284 : vector<2x32xf32>
    %286 = math.exp %285 : vector<2x32xf32>
    %cst_77 = arith.constant 1.000000e+00 : f32
    %287 = vector.broadcast %cst_77 : f32 to vector<2x32xf32>
    %288 = arith.addf %287, %286 : vector<2x32xf32>
    %289 = arith.divf %287, %288 : vector<2x32xf32>
    %290 = arith.mulf %281, %266 : vector<2x32xf32>
    %291 = arith.mulf %275, %283 : vector<2x32xf32>
    %292 = arith.addf %290, %291 : vector<2x32xf32>
    %293 = math.tanh %292 : vector<2x32xf32>
    %294 = arith.mulf %289, %293 : vector<2x32xf32>
    %295 = vector.extract_strided_slice %262 {offsets = [2, 0], sizes = [2, 128], strides = [1, 1]} : vector<16x128xf32> to vector<2x128xf32>
    %cst_78 = arith.constant dense<0.000000e+00> : vector<2x128xf32>
    %296 = tpu.matmul %294, %264, %cst_78 {dimension_numbers = #tpu.dot_dimension_numbers<[1], [0], [0], [1], [0, 0, 1, 1], [], []>} : vector<2x32xf32>, vector<32x128xf32>, vector<2x128xf32> -> vector<2x128xf32>
    %297 = arith.addf %295, %296 : vector<2x128xf32>
    %298 = vector.extract_strided_slice %297 {offsets = [0, 0], sizes = [2, 32], strides = [1, 1]} : vector<2x128xf32> to vector<2x32xf32>
    %299 = arith.negf %298 : vector<2x32xf32>
    %300 = math.exp %299 : vector<2x32xf32>
    %cst_79 = arith.constant 1.000000e+00 : f32
    %301 = vector.broadcast %cst_79 : f32 to vector<2x32xf32>
    %302 = arith.addf %301, %300 : vector<2x32xf32>
    %303 = arith.divf %301, %302 : vector<2x32xf32>
    %304 = vector.extract_strided_slice %297 {offsets = [0, 32], sizes = [2, 32], strides = [1, 1]} : vector<2x128xf32> to vector<2x32xf32>
    %305 = arith.negf %304 : vector<2x32xf32>
    %306 = math.exp %305 : vector<2x32xf32>
    %cst_80 = arith.constant 1.000000e+00 : f32
    %307 = vector.broadcast %cst_80 : f32 to vector<2x32xf32>
    %308 = arith.addf %307, %306 : vector<2x32xf32>
    %309 = arith.divf %307, %308 : vector<2x32xf32>
    %310 = vector.extract_strided_slice %297 {offsets = [0, 64], sizes = [2, 32], strides = [1, 1]} : vector<2x128xf32> to vector<2x32xf32>
    %311 = math.tanh %310 : vector<2x32xf32>
    %312 = vector.extract_strided_slice %297 {offsets = [0, 96], sizes = [2, 32], strides = [1, 1]} : vector<2x128xf32> to vector<2x32xf32>
    %313 = arith.negf %312 : vector<2x32xf32>
    %314 = math.exp %313 : vector<2x32xf32>
    %cst_81 = arith.constant 1.000000e+00 : f32
    %315 = vector.broadcast %cst_81 : f32 to vector<2x32xf32>
    %316 = arith.addf %315, %314 : vector<2x32xf32>
    %317 = arith.divf %315, %316 : vector<2x32xf32>
    %318 = arith.mulf %309, %292 : vector<2x32xf32>
    %319 = arith.mulf %303, %311 : vector<2x32xf32>
    %320 = arith.addf %318, %319 : vector<2x32xf32>
    %321 = math.tanh %320 : vector<2x32xf32>
    %322 = arith.mulf %317, %321 : vector<2x32xf32>
    %323 = vector.extract_strided_slice %262 {offsets = [4, 0], sizes = [2, 128], strides = [1, 1]} : vector<16x128xf32> to vector<2x128xf32>
    %cst_82 = arith.constant dense<0.000000e+00> : vector<2x128xf32>
    %324 = tpu.matmul %322, %264, %cst_82 {dimension_numbers = #tpu.dot_dimension_numbers<[1], [0], [0], [1], [0, 0, 1, 1], [], []>} : vector<2x32xf32>, vector<32x128xf32>, vector<2x128xf32> -> vector<2x128xf32>
    %325 = arith.addf %323, %324 : vector<2x128xf32>
    %326 = vector.extract_strided_slice %325 {offsets = [0, 0], sizes = [2, 32], strides = [1, 1]} : vector<2x128xf32> to vector<2x32xf32>
    %327 = arith.negf %326 : vector<2x32xf32>
    %328 = math.exp %327 : vector<2x32xf32>
    %cst_83 = arith.constant 1.000000e+00 : f32
    %329 = vector.broadcast %cst_83 : f32 to vector<2x32xf32>
    %330 = arith.addf %329, %328 : vector<2x32xf32>
    %331 = arith.divf %329, %330 : vector<2x32xf32>
    %332 = vector.extract_strided_slice %325 {offsets = [0, 32], sizes = [2, 32], strides = [1, 1]} : vector<2x128xf32> to vector<2x32xf32>
    %333 = arith.negf %332 : vector<2x32xf32>
    %334 = math.exp %333 : vector<2x32xf32>
    %cst_84 = arith.constant 1.000000e+00 : f32
    %335 = vector.broadcast %cst_84 : f32 to vector<2x32xf32>
    %336 = arith.addf %335, %334 : vector<2x32xf32>
    %337 = arith.divf %335, %336 : vector<2x32xf32>
    %338 = vector.extract_strided_slice %325 {offsets = [0, 64], sizes = [2, 32], strides = [1, 1]} : vector<2x128xf32> to vector<2x32xf32>
    %339 = math.tanh %338 : vector<2x32xf32>
    %340 = vector.extract_strided_slice %325 {offsets = [0, 96], sizes = [2, 32], strides = [1, 1]} : vector<2x128xf32> to vector<2x32xf32>
    %341 = arith.negf %340 : vector<2x32xf32>
    %342 = math.exp %341 : vector<2x32xf32>
    %cst_85 = arith.constant 1.000000e+00 : f32
    %343 = vector.broadcast %cst_85 : f32 to vector<2x32xf32>
    %344 = arith.addf %343, %342 : vector<2x32xf32>
    %345 = arith.divf %343, %344 : vector<2x32xf32>
    %346 = arith.mulf %337, %320 : vector<2x32xf32>
    %347 = arith.mulf %331, %339 : vector<2x32xf32>
    %348 = arith.addf %346, %347 : vector<2x32xf32>
    %349 = math.tanh %348 : vector<2x32xf32>
    %350 = arith.mulf %345, %349 : vector<2x32xf32>
    %351 = vector.extract_strided_slice %262 {offsets = [6, 0], sizes = [2, 128], strides = [1, 1]} : vector<16x128xf32> to vector<2x128xf32>
    %cst_86 = arith.constant dense<0.000000e+00> : vector<2x128xf32>
    %352 = tpu.matmul %350, %264, %cst_86 {dimension_numbers = #tpu.dot_dimension_numbers<[1], [0], [0], [1], [0, 0, 1, 1], [], []>} : vector<2x32xf32>, vector<32x128xf32>, vector<2x128xf32> -> vector<2x128xf32>
    %353 = arith.addf %351, %352 : vector<2x128xf32>
    %354 = vector.extract_strided_slice %353 {offsets = [0, 0], sizes = [2, 32], strides = [1, 1]} : vector<2x128xf32> to vector<2x32xf32>
    %355 = arith.negf %354 : vector<2x32xf32>
    %356 = math.exp %355 : vector<2x32xf32>
    %cst_87 = arith.constant 1.000000e+00 : f32
    %357 = vector.broadcast %cst_87 : f32 to vector<2x32xf32>
    %358 = arith.addf %357, %356 : vector<2x32xf32>
    %359 = arith.divf %357, %358 : vector<2x32xf32>
    %360 = vector.extract_strided_slice %353 {offsets = [0, 32], sizes = [2, 32], strides = [1, 1]} : vector<2x128xf32> to vector<2x32xf32>
    %361 = arith.negf %360 : vector<2x32xf32>
    %362 = math.exp %361 : vector<2x32xf32>
    %cst_88 = arith.constant 1.000000e+00 : f32
    %363 = vector.broadcast %cst_88 : f32 to vector<2x32xf32>
    %364 = arith.addf %363, %362 : vector<2x32xf32>
    %365 = arith.divf %363, %364 : vector<2x32xf32>
    %366 = vector.extract_strided_slice %353 {offsets = [0, 64], sizes = [2, 32], strides = [1, 1]} : vector<2x128xf32> to vector<2x32xf32>
    %367 = math.tanh %366 : vector<2x32xf32>
    %368 = vector.extract_strided_slice %353 {offsets = [0, 96], sizes = [2, 32], strides = [1, 1]} : vector<2x128xf32> to vector<2x32xf32>
    %369 = arith.negf %368 : vector<2x32xf32>
    %370 = math.exp %369 : vector<2x32xf32>
    %cst_89 = arith.constant 1.000000e+00 : f32
    %371 = vector.broadcast %cst_89 : f32 to vector<2x32xf32>
    %372 = arith.addf %371, %370 : vector<2x32xf32>
    %373 = arith.divf %371, %372 : vector<2x32xf32>
    %374 = arith.mulf %365, %348 : vector<2x32xf32>
    %375 = arith.mulf %359, %367 : vector<2x32xf32>
    %376 = arith.addf %374, %375 : vector<2x32xf32>
    %377 = math.tanh %376 : vector<2x32xf32>
    %378 = arith.mulf %373, %377 : vector<2x32xf32>
    %379 = vector.extract_strided_slice %262 {offsets = [8, 0], sizes = [2, 128], strides = [1, 1]} : vector<16x128xf32> to vector<2x128xf32>
    %cst_90 = arith.constant dense<0.000000e+00> : vector<2x128xf32>
    %380 = tpu.matmul %378, %264, %cst_90 {dimension_numbers = #tpu.dot_dimension_numbers<[1], [0], [0], [1], [0, 0, 1, 1], [], []>} : vector<2x32xf32>, vector<32x128xf32>, vector<2x128xf32> -> vector<2x128xf32>
    %381 = arith.addf %379, %380 : vector<2x128xf32>
    %382 = vector.extract_strided_slice %381 {offsets = [0, 0], sizes = [2, 32], strides = [1, 1]} : vector<2x128xf32> to vector<2x32xf32>
    %383 = arith.negf %382 : vector<2x32xf32>
    %384 = math.exp %383 : vector<2x32xf32>
    %cst_91 = arith.constant 1.000000e+00 : f32
    %385 = vector.broadcast %cst_91 : f32 to vector<2x32xf32>
    %386 = arith.addf %385, %384 : vector<2x32xf32>
    %387 = arith.divf %385, %386 : vector<2x32xf32>
    %388 = vector.extract_strided_slice %381 {offsets = [0, 32], sizes = [2, 32], strides = [1, 1]} : vector<2x128xf32> to vector<2x32xf32>
    %389 = arith.negf %388 : vector<2x32xf32>
    %390 = math.exp %389 : vector<2x32xf32>
    %cst_92 = arith.constant 1.000000e+00 : f32
    %391 = vector.broadcast %cst_92 : f32 to vector<2x32xf32>
    %392 = arith.addf %391, %390 : vector<2x32xf32>
    %393 = arith.divf %391, %392 : vector<2x32xf32>
    %394 = vector.extract_strided_slice %381 {offsets = [0, 64], sizes = [2, 32], strides = [1, 1]} : vector<2x128xf32> to vector<2x32xf32>
    %395 = math.tanh %394 : vector<2x32xf32>
    %396 = vector.extract_strided_slice %381 {offsets = [0, 96], sizes = [2, 32], strides = [1, 1]} : vector<2x128xf32> to vector<2x32xf32>
    %397 = arith.negf %396 : vector<2x32xf32>
    %398 = math.exp %397 : vector<2x32xf32>
    %cst_93 = arith.constant 1.000000e+00 : f32
    %399 = vector.broadcast %cst_93 : f32 to vector<2x32xf32>
    %400 = arith.addf %399, %398 : vector<2x32xf32>
    %401 = arith.divf %399, %400 : vector<2x32xf32>
    %402 = arith.mulf %393, %376 : vector<2x32xf32>
    %403 = arith.mulf %387, %395 : vector<2x32xf32>
    %404 = arith.addf %402, %403 : vector<2x32xf32>
    %405 = math.tanh %404 : vector<2x32xf32>
    %406 = arith.mulf %401, %405 : vector<2x32xf32>
    %407 = vector.extract_strided_slice %262 {offsets = [10, 0], sizes = [2, 128], strides = [1, 1]} : vector<16x128xf32> to vector<2x128xf32>
    %cst_94 = arith.constant dense<0.000000e+00> : vector<2x128xf32>
    %408 = tpu.matmul %406, %264, %cst_94 {dimension_numbers = #tpu.dot_dimension_numbers<[1], [0], [0], [1], [0, 0, 1, 1], [], []>} : vector<2x32xf32>, vector<32x128xf32>, vector<2x128xf32> -> vector<2x128xf32>
    %409 = arith.addf %407, %408 : vector<2x128xf32>
    %410 = vector.extract_strided_slice %409 {offsets = [0, 0], sizes = [2, 32], strides = [1, 1]} : vector<2x128xf32> to vector<2x32xf32>
    %411 = arith.negf %410 : vector<2x32xf32>
    %412 = math.exp %411 : vector<2x32xf32>
    %cst_95 = arith.constant 1.000000e+00 : f32
    %413 = vector.broadcast %cst_95 : f32 to vector<2x32xf32>
    %414 = arith.addf %413, %412 : vector<2x32xf32>
    %415 = arith.divf %413, %414 : vector<2x32xf32>
    %416 = vector.extract_strided_slice %409 {offsets = [0, 32], sizes = [2, 32], strides = [1, 1]} : vector<2x128xf32> to vector<2x32xf32>
    %417 = arith.negf %416 : vector<2x32xf32>
    %418 = math.exp %417 : vector<2x32xf32>
    %cst_96 = arith.constant 1.000000e+00 : f32
    %419 = vector.broadcast %cst_96 : f32 to vector<2x32xf32>
    %420 = arith.addf %419, %418 : vector<2x32xf32>
    %421 = arith.divf %419, %420 : vector<2x32xf32>
    %422 = vector.extract_strided_slice %409 {offsets = [0, 64], sizes = [2, 32], strides = [1, 1]} : vector<2x128xf32> to vector<2x32xf32>
    %423 = math.tanh %422 : vector<2x32xf32>
    %424 = vector.extract_strided_slice %409 {offsets = [0, 96], sizes = [2, 32], strides = [1, 1]} : vector<2x128xf32> to vector<2x32xf32>
    %425 = arith.negf %424 : vector<2x32xf32>
    %426 = math.exp %425 : vector<2x32xf32>
    %cst_97 = arith.constant 1.000000e+00 : f32
    %427 = vector.broadcast %cst_97 : f32 to vector<2x32xf32>
    %428 = arith.addf %427, %426 : vector<2x32xf32>
    %429 = arith.divf %427, %428 : vector<2x32xf32>
    %430 = arith.mulf %421, %404 : vector<2x32xf32>
    %431 = arith.mulf %415, %423 : vector<2x32xf32>
    %432 = arith.addf %430, %431 : vector<2x32xf32>
    %433 = math.tanh %432 : vector<2x32xf32>
    %434 = arith.mulf %429, %433 : vector<2x32xf32>
    %435 = vector.extract_strided_slice %262 {offsets = [12, 0], sizes = [2, 128], strides = [1, 1]} : vector<16x128xf32> to vector<2x128xf32>
    %cst_98 = arith.constant dense<0.000000e+00> : vector<2x128xf32>
    %436 = tpu.matmul %434, %264, %cst_98 {dimension_numbers = #tpu.dot_dimension_numbers<[1], [0], [0], [1], [0, 0, 1, 1], [], []>} : vector<2x32xf32>, vector<32x128xf32>, vector<2x128xf32> -> vector<2x128xf32>
    %437 = arith.addf %435, %436 : vector<2x128xf32>
    %438 = vector.extract_strided_slice %437 {offsets = [0, 0], sizes = [2, 32], strides = [1, 1]} : vector<2x128xf32> to vector<2x32xf32>
    %439 = arith.negf %438 : vector<2x32xf32>
    %440 = math.exp %439 : vector<2x32xf32>
    %cst_99 = arith.constant 1.000000e+00 : f32
    %441 = vector.broadcast %cst_99 : f32 to vector<2x32xf32>
    %442 = arith.addf %441, %440 : vector<2x32xf32>
    %443 = arith.divf %441, %442 : vector<2x32xf32>
    %444 = vector.extract_strided_slice %437 {offsets = [0, 32], sizes = [2, 32], strides = [1, 1]} : vector<2x128xf32> to vector<2x32xf32>
    %445 = arith.negf %444 : vector<2x32xf32>
    %446 = math.exp %445 : vector<2x32xf32>
    %cst_100 = arith.constant 1.000000e+00 : f32
    %447 = vector.broadcast %cst_100 : f32 to vector<2x32xf32>
    %448 = arith.addf %447, %446 : vector<2x32xf32>
    %449 = arith.divf %447, %448 : vector<2x32xf32>
    %450 = vector.extract_strided_slice %437 {offsets = [0, 64], sizes = [2, 32], strides = [1, 1]} : vector<2x128xf32> to vector<2x32xf32>
    %451 = math.tanh %450 : vector<2x32xf32>
    %452 = vector.extract_strided_slice %437 {offsets = [0, 96], sizes = [2, 32], strides = [1, 1]} : vector<2x128xf32> to vector<2x32xf32>
    %453 = arith.negf %452 : vector<2x32xf32>
    %454 = math.exp %453 : vector<2x32xf32>
    %cst_101 = arith.constant 1.000000e+00 : f32
    %455 = vector.broadcast %cst_101 : f32 to vector<2x32xf32>
    %456 = arith.addf %455, %454 : vector<2x32xf32>
    %457 = arith.divf %455, %456 : vector<2x32xf32>
    %458 = arith.mulf %449, %432 : vector<2x32xf32>
    %459 = arith.mulf %443, %451 : vector<2x32xf32>
    %460 = arith.addf %458, %459 : vector<2x32xf32>
    %461 = math.tanh %460 : vector<2x32xf32>
    %462 = arith.mulf %457, %461 : vector<2x32xf32>
    %463 = vector.extract_strided_slice %262 {offsets = [14, 0], sizes = [2, 128], strides = [1, 1]} : vector<16x128xf32> to vector<2x128xf32>
    %cst_102 = arith.constant dense<0.000000e+00> : vector<2x128xf32>
    %464 = tpu.matmul %462, %264, %cst_102 {dimension_numbers = #tpu.dot_dimension_numbers<[1], [0], [0], [1], [0, 0, 1, 1], [], []>} : vector<2x32xf32>, vector<32x128xf32>, vector<2x128xf32> -> vector<2x128xf32>
    %465 = arith.addf %463, %464 : vector<2x128xf32>
    %466 = vector.extract_strided_slice %465 {offsets = [0, 0], sizes = [2, 32], strides = [1, 1]} : vector<2x128xf32> to vector<2x32xf32>
    %467 = arith.negf %466 : vector<2x32xf32>
    %468 = math.exp %467 : vector<2x32xf32>
    %cst_103 = arith.constant 1.000000e+00 : f32
    %469 = vector.broadcast %cst_103 : f32 to vector<2x32xf32>
    %470 = arith.addf %469, %468 : vector<2x32xf32>
    %471 = arith.divf %469, %470 : vector<2x32xf32>
    %472 = vector.extract_strided_slice %465 {offsets = [0, 32], sizes = [2, 32], strides = [1, 1]} : vector<2x128xf32> to vector<2x32xf32>
    %473 = arith.negf %472 : vector<2x32xf32>
    %474 = math.exp %473 : vector<2x32xf32>
    %cst_104 = arith.constant 1.000000e+00 : f32
    %475 = vector.broadcast %cst_104 : f32 to vector<2x32xf32>
    %476 = arith.addf %475, %474 : vector<2x32xf32>
    %477 = arith.divf %475, %476 : vector<2x32xf32>
    %478 = vector.extract_strided_slice %465 {offsets = [0, 64], sizes = [2, 32], strides = [1, 1]} : vector<2x128xf32> to vector<2x32xf32>
    %479 = math.tanh %478 : vector<2x32xf32>
    %480 = vector.extract_strided_slice %465 {offsets = [0, 96], sizes = [2, 32], strides = [1, 1]} : vector<2x128xf32> to vector<2x32xf32>
    %481 = arith.negf %480 : vector<2x32xf32>
    %482 = math.exp %481 : vector<2x32xf32>
    %cst_105 = arith.constant 1.000000e+00 : f32
    %483 = vector.broadcast %cst_105 : f32 to vector<2x32xf32>
    %484 = arith.addf %483, %482 : vector<2x32xf32>
    %485 = arith.divf %483, %484 : vector<2x32xf32>
    %486 = arith.mulf %477, %460 : vector<2x32xf32>
    %487 = arith.mulf %471, %479 : vector<2x32xf32>
    %488 = arith.addf %486, %487 : vector<2x32xf32>
    %489 = math.tanh %488 : vector<2x32xf32>
    %490 = arith.mulf %485, %489 : vector<2x32xf32>
    %491 = tpu.concatenate %294, %322, %350, %378, %406, %434, %462, %490 in 0 : vector<2x32xf32>, vector<2x32xf32>, vector<2x32xf32>, vector<2x32xf32>, vector<2x32xf32>, vector<2x32xf32>, vector<2x32xf32>, vector<2x32xf32> -> vector<16x32xf32>
    %c0_106 = arith.constant 0 : index
    %c0_107 = arith.constant 0 : index
    %492 = vector.load %arg9[%c0_106, %c0_107] : memref<32x8xf32, #tpu.memory_space<vmem>>, vector<32x8xf32>
    %cst_108 = arith.constant dense<0.000000e+00> : vector<16x8xf32>
    %493 = tpu.matmul %491, %492, %cst_108 {dimension_numbers = #tpu.dot_dimension_numbers<[1], [0], [0], [1], [0, 0, 1, 1], [], []>} : vector<16x32xf32>, vector<32x8xf32>, vector<16x8xf32> -> vector<16x8xf32>
    %c0_109 = arith.constant 0 : index
    %c0_110 = arith.constant 0 : index
    %494 = vector.load %arg10[%c0_109, %c0_110] : memref<1x8xf32, #tpu.memory_space<vmem>>, vector<1x8xf32>
    %495 = vector.broadcast %494 : vector<1x8xf32> to vector<16x8xf32>
    %496 = arith.addf %493, %495 : vector<16x8xf32>
    %c0_111 = arith.constant 0 : index
    %c0_112 = arith.constant 0 : index
    %497 = vector.load %arg11[%c0_111, %c0_112] : memref<16x8xf32, #tpu.memory_space<vmem>>, vector<16x8xf32>
    tpu.vector_store %arg11[%c0_111, %c0_112], %496 {strides = array<i32>} : memref<16x8xf32, #tpu.memory_space<vmem>>, vector<16x8xf32>,
    return
  }
}

</mosaic_0001>

<bundles_post_ra>
// kernel: sqalstm_model_forward.1
= control target key start
LH: loop header
LB: loop body
LE: loop exit
PB: predicated region body
PF: predicated region fallthrough
CT: control target
= control target key end

     0   :  { %16 = vsyncpa [#allocation3], 0  ;;  %s3573_s0 = inlined_call_operand.vmem [shape: f32[16,16], index: 0, kind: input, shape index: {}]   ;;  %s3574_s1 = inlined_call_operand.vmem [shape: f32[2,8], index: 1, kind: input, shape index: {}]   ;;  %s3575_s2 = inlined_call_operand.vmem [shape: f32[2,8], index: 2, kind: input, shape index: {}]   ;;  %s3576_s3 = inlined_call_operand.vmem [shape: f32[16,128], index: 3, kind: input, shape index: {}]   ;;  %s3577_s4 = inlined_call_operand.vmem [shape: f32[1,32,128], index: 4, kind: input, shape index: {}]   ;;  %s3578_s5 = inlined_call_operand.vmem [shape: f32[2,32,128], index: 5, kind: input, shape index: {}]   ;;  %s3579_s6 = inlined_call_operand.hbm [shape: f32[2,8,128], index: 6, kind: input, shape index: {}]   ;;  %s3580_s7 = inlined_call_operand.hbm [shape: f32[2,8,128], index: 7, kind: input, shape index: {}]   ;;  %s3581_s8 = inlined_call_operand.hbm [shape: f32[2,1,128], index: 8, kind: input, shape index: {}]   ;;  %s3582_s9 = inlined_call_operand.vmem [shape: f32[32,8], index: 9, kind: input, shape index: {}]   ;;  %s3583_s10 = inlined_call_operand.vmem [shape: f32[1,8], index: 10, kind: input, shape index: {}]   ;;  %s3584_s11 = inlined_call_operand.vmem [shape: f32[16,8], index: 11, kind: output, shape index: {}]  }
   0x1   :  { %17 = vsyncpa [#allocation5], 0  ;;  %s3098_s17 = smov [#allocation4]   ;;  %s3099_s19 = smov [#allocation2]  }
   0x2   :  { %s47_s18 = sshll.u32 %s3098_s17, 4  ;;  %s35_s20 = sshll.u32 %s3099_s19, 4  ;;  %s48_s18 = int_to_ptr.vmem [resolvable:$true] %s47_s18  ;;  %s3170_s20 = int_to_ptr.vmem [resolvable:$true] %s35_s20 }
   0x3   :  { %s3028_s23 = scalar_lea.hbm %s3580_s7, 256 }
   0x4   :  { %p3029_p0 = scmp.ne.s32.totalorder %s3580_s7, %s3028_s23  ;;  %p3032_p1 = scmp.lt.u32.totalorder %s3028_s23, %s3580_s7 }
   0x6   :  { %p3034_p2 = pnand %p3032_p1, %p3029_p0 }
   0x8   :  { %3037 = shalt.err (!%p3034_p2)
}
   0x9   :  { %s3038_s28 = scalar_lea.vmem %s48_s18, 256  ;;  %p3043_p4 = scmp.lt.s32.totalorder %s48_s18, %s48_s18 }
   0xa   :  { %p3039_p3 = scmp.ne.s32.totalorder %s48_s18, %s3038_s28  ;;  %p3044_p5 = scmp.lt.s32.totalorder %s3038_s28, %s3038_s28 }
   0xc   :  { %p3045_p6 = por %p3044_p5, %p3043_p4 }
   0xe   :  { %p3046_p7 = pnand %p3045_p6, %p3039_p3 }
  0x10   :  { %3049 = shalt.err (!%p3046_p7)
}
  0x11   :  { %s3100_s29 = smov 128   ;;  %s3101_s30 = smov 8  }
  0x12   :  { %53 = dma.hbm_to_vmem [thread:$0]  %s3580_s7, 256, %s48_s18, [#allocation5], %s3100_s29, %s3100_s29, %s3101_s30  }
  0x13   :  { %s3050_s16 = scalar_lea.hbm %s3579_s6, 256 }
  0x14   :  { %p3051_p8 = scmp.ne.s32.totalorder %s3579_s6, %s3050_s16  ;;  %p3054_p9 = scmp.lt.u32.totalorder %s3050_s16, %s3579_s6 }
  0x16   :  { %p3056_p10 = pnand %p3054_p9, %p3051_p8 }
  0x18   :  { %3059 = shalt.err (!%p3056_p10)
}
  0x19   :  { %s3060_s23 = scalar_lea.vmem %s3170_s20, 256  ;;  %p3065_p12 = scmp.lt.s32.totalorder %s3170_s20, %s3170_s20 }
  0x1a   :  { %p3061_p11 = scmp.ne.s32.totalorder %s3170_s20, %s3060_s23  ;;  %p3066_p13 = scmp.lt.s32.totalorder %s3060_s23, %s3060_s23 }
  0x1c   :  { %p3067_p0 = por %p3066_p13, %p3065_p12 }
  0x1e   :  { %p3068_p1 = pnand %p3067_p0, %p3061_p11 }
  0x20   :  { %3071 = shalt.err (!%p3068_p1)
}
  0x21   :  { %41 = dma.hbm_to_vmem [thread:$0]  %s3579_s6, 256, %s3170_s20, [#allocation3], %s3100_s29, %s3100_s29, %s3101_s30  }
  0x22   :  { %s3102_s24 = smov [#allocation6]   ;;  %s3072_s28 = scalar_lea.hbm %s3581_s8, 32 }
  0x23   :  { %s59_s25 = sshll.u32 %s3102_s24, 4  ;;  %p3073_p2 = scmp.ne.s32.totalorder %s3581_s8, %s3072_s28  ;;  %s60_s25 = int_to_ptr.vmem [resolvable:$true] %s59_s25 }
  0x24   :  { %p3076_p3 = scmp.lt.u32.totalorder %s3072_s28, %s3581_s8 }
  0x26   :  { %p3078_p4 = pnand %p3076_p3, %p3073_p2 }
  0x28   :  { %3081 = shalt.err (!%p3078_p4)
}
  0x29   :  { %s3082_s16 = scalar_lea.vmem %s60_s25, 32  ;;  %p3087_p6 = scmp.lt.s32.totalorder %s60_s25, %s60_s25 }
  0x2a   :  { %p3083_p5 = scmp.ne.s32.totalorder %s60_s25, %s3082_s16  ;;  %p3088_p7 = scmp.lt.s32.totalorder %s3082_s16, %s3082_s16 }
  0x2c   :  { %p3089_p8 = por %p3088_p7, %p3087_p6 }
  0x2e   :  { %p3090_p9 = pnand %p3089_p8, %p3083_p5 }
  0x30   :  { %3093 = shalt.err (!%p3090_p9)
}
  0x31   :  { %s3103_s6 = smov 16   ;;  %s3104_s20 = smov 1  }
  0x32   :  { %65 = dma.hbm_to_vmem [thread:$0]  %s3581_s8, 32, %s60_s25, [#allocation5], %s3103_s6, %s3103_s6, %s3104_s20  }
  0x33   :  { %3094 = dma.done.wait [#allocation3], 256  }
  0x34   :  { %3095 = vsyncadd [#allocation3], 4294967040 }
  0x35   :  { %3096 = dma.done.wait [#allocation5], 288  }
  0x36   :  { %3097 = vsyncadd [#allocation5], 4294967008  ;;  %v3105_v0 = vmov 0.0   ;;  %vm3106_vm0 = vmmov 0   ;;  %vm87_vm1 = vcmask 64512   ;;  %v86_v1 = vld [vmem:[#allocation4] sm:$0xff] }
  0x37   :  { %2547 = vmatprep.subr.mxu0 %v3105_v0  ;;  %2552 = vmatprep.subr.mxu1 %v3105_v0  ;;  %v85_v2 = vld [vmem:[#allocation2] sm:$0xff]  ;;  %vm255_vm2 = vcmask 130048   ;;  %v84_v6 = vld [vmem:[%s3576_s3 + $0x8] sm:$0xff]  ;;  %v3107_v11 = vmov 0.0|0.0   ;;  %v339_v13 = vld [vmem:[%s3578_s5 + $0x10] sm:$0xff]  ;;  %vm249_vm3 = vcmask 1041408  }
  0x38   :  { %2549 = vmatprep.mubr.msk.f32.mxu0 %vm3106_vm0, %v3105_v0  ;;  %2554 = vmatprep.mubr.msk.f32.mxu1 %vm3106_vm0, %v3105_v0  ;;  %v3222_v3 = vld [vmem:[%s3575_s2] sm:$0x3]  ;;  %v338_v9 = vld [vmem:[%s3578_s5 + $0x8] sm:$0xff]  ;;  %v340_v14 = vld [vmem:[%s3578_s5 + $0x18] sm:$0xff]  ;;  %vm251_vm4 = vcmask 1043456   ;;  %vm253_vm5 = vcmask 1045504  }
  0x39   :  { %2548 = vmatpush3.msra.mxu0 %v86_v1  ;;  %2553 = vmatpush3.msra.mxu1 %v85_v2  ;;  %v3227_v4 = vld [vmem:[%s3574_s1] sm:$0x3]  ;;  %v82_v15 = vld [vmem:[%s3573_s0 + $0x8] sm:$0xff]  ;;  %v3264_v16 = vpack.c.bf16 %v340_v14, %v339_v13  ;;  %s3109_s16 = smov 32   ;;  %vm341_vm6 = vcmask 261120  }
  0x3a   :  { %v83_v5 = vld [vmem:[%s3576_s3] sm:$0xff]  ;;  %2550 = vmatmul.mubr.msk.f32.vlgmr.msra.gmra.mrb[0].mxu0 %vm87_vm1, %v3222_v3  ;;  %2555 = vmatmul.mubr.msk.f32.vlgmr.msra.gmra.mrb[0].mxu1 %vm87_vm1, %v3227_v4 }
  0x3b   :  { %v2772_v7 = vpack.c.bf16 %v84_v6, %v83_v5  ;;  %v337_v8 = vld [vmem:[%s3578_s5] sm:$0xff]  ;;  %2776 = vmatprep.subr.bf16.mxu1 %v3107_v11  ;;  %2572 = vmatprep.mubr.msk.f32.mxu1 %vm3106_vm0, %v3105_v0 }
  0x3c   :  { %v81_v10 = vld [vmem:[%s3573_s0] sm:$0xff]  ;;  %v3249_v12 = vpack.c.bf16 %v338_v9, %v337_v8  ;;  %s3108_s0 = smov 64  }
  0x3d   :  { %2561 = vmatprep.mubr.msk.f32.mxu0 %vm255_vm2, %v81_v10  ;;  %2773 = vmatprep.subr.bf16.mxu0 %v2772_v7  ;;  %v2398_v19 = vld [vmem:[#allocation6] ss:$0 sm:$0xff] }
  0x3e   :  { %2778 = vmatpush3.bf16.msra.mxu1 %v3249_v12  ;;  %2775 = vmatpush3.bf16.msra.mxu0 %v2772_v7 }
  0x3f   :  { %2779 = vmatprep.subr.bf16.mxu1 %v3107_v11  ;;  %2782 = vmatprep.subr.bf16.mxu0 %v3107_v11 }
  0x41   :  { %2562 = vmatmul.mubr.msk.f32.vlgmr.msra.gmra.mrb[2].mxu0 %vm255_vm2, %v82_v15 }
  0x42   :  { %2781 = vmatpush3.bf16.msra.mxu1 %v3264_v16  ;;  %2784 = vmatpush3.bf16.msra.mxu0 %v3249_v12 }
  0x43   :  { %2785 = vmatprep.subr.bf16.mxu0 %v3107_v11  ;;  %2583 = vmatprep.mubr.msk.f32.mxu0 %vm3106_vm0, %v3105_v0 }
  0x44   :  { %2788 = vmatprep.subr.bf16.mxu1 %v3107_v11 }
  0x45   :  { %2573 = vmatmul.mubr.f32.vlgmr.msra.gmra.mrb[2].mxu1 %v3105_v0 }
  0x46   :  { %2787 = vmatpush3.bf16.msra.mxu0 %v3264_v16  ;;  %2790 = vmatpush3.bf16.msra.mxu1 %v3249_v12 }
  0x47   :  { %2791 = vmatprep.subr.bf16.mxu1 %v3107_v11  ;;  %2594 = vmatprep.mubr.msk.f32.mxu1 %vm3106_vm0, %v3105_v0 }
  0x48   :  { %2794 = vmatprep.subr.bf16.mxu0 %v3107_v11 }
  0x4a   :  { %2793 = vmatpush3.bf16.msra.mxu1 %v3264_v16 }
  0x4b   :  { %2800 = vmatprep.subr.bf16.mxu1 %v3107_v11 }
 0x10d   :  { %v157_v17 = vpop.f32.mrb[0].mxu0  ;;  %v230_v18 = vpop.f32.mrb[0].mxu1 }
 0x10e   :  { %v231_v20 = vadd.f32 %v230_v18, %v157_v17  ;;  %v2551_v21 = vpop.f32.mrb[1].mxu0  ;;  %v2556_v22 = vpop.f32.mrb[1].mxu1 }
 0x110   :  { %v241_v23 = vadd.f32 %v2398_v19, %v231_v20 }
 0x112   :  { %v243_v24 = vrot.slane %v241_v23, 6  ;;  %v245_v25 = vrot.slane %v241_v23, 4  ;;  %v247_v27 = vrot.slane %v241_v23, 2 }
 0x114   :  { %v2563_v26 = vpop.f32.mrb[2].mxu0  ;;  %v250_v28 = vsel %vm249_vm3, %v241_v23, %v243_v24 }
 0x115   :  { %v328_v29 = vpop.f32.mrb[3].mxu0  ;;  %v252_v30 = vsel %vm251_vm4, %v250_v28, %v245_v25 }
 0x116   :  { %v254_v31 = vsel %vm253_vm5, %v252_v30, %v247_v27 }
 0x117   :  { %v3287_v32 = vadd.f32 %v2563_v26, %v254_v31  ;;  %v3289_v33 = vadd.f32 %v328_v29, %v254_v31 }
 0x118   :  { %v411_v34 = vpop.f32.mrb[2].mxu1 }
 0x119   :  { %v2574_v35 = vpop.f32.mrb[3].mxu1  ;;  %v415_v36 = vadd.f32 %v411_v34, %v3289_v33 }
 0x11b   :  { %2900 = vtanh.f32 %v415_v36  ;;  %v2401_v38 = vmul.f32 -1.442695, %v415_v36 }
 0x11d   :  { %2902 = vpow2.f32 %v2401_v38 }
 0x125   :  { %v2901_v37 = vpop.eup %2900 }
 0x126   :  { %425 = vrot.lane.b32.xlu0 %v2901_v37, %s3108_s0 }
 0x127   :  { %v2903_v39 = vpop.eup %2902 }
 0x128   :  { %v419_v40 = vadd.f32 1.0, %v2903_v39 }
 0x12a   :  { %2904 = vrcp.f32 %v419_v40 }
 0x134   :  { %v2905_v41 = vpop.eup %2904 }
 0x135   :  { %v423_v44 = vmul.f32 0.0, %v2905_v41 }
 0x198   :  { %v426_v42 = vpop.permute.xlu0 %425 }
 0x199   :  { %v428_v43 = vmul.f32 %v2905_v41, %v426_v42 }
 0x19b   :  { %430 = vrot.lane.b32.xlu0 %v428_v43, %s3109_s16 }
 0x20d   :  { %v431_v45 = vpop.permute.xlu0 %430 }
 0x20e   :  { %v433_v46 = vadd.f32 %v431_v45, %v423_v44 }
 0x210   :  { %2906 = vtanh.f32 %v433_v46  ;;  %v527_v62 = vrot.slane %v433_v46, 6 }
 0x21a   :  { %v2907_v47 = vpop.eup %2906 }
 0x21b   :  { %436 = vrot.lane.b32.xlu1 %v2907_v47, %s3108_s0 }
 0x28d   :  { %v437_v48 = vpop.permute.xlu1 %436 }
 0x28e   :  { %v3295_v49 = vmul.f32 %v2905_v41, %v437_v48 }
 0x290   :  { %441 = vrot.lane.b32.xlu1 %v3295_v49, %s3109_s16 }
 0x302   :  { %v442_v50 = vpop.permute.xlu1 %441 }
 0x303   :  { %2584 = vmatmul.mubr.msk.f32.vlgmr.msra.gmra.mrb[4].mxu0 %vm341_vm6, %v442_v50 }
 0x304   :  { %2796 = vmatpush3.bf16.msra.mxu0 %v3249_v12  ;;  %2605 = vmatprep.mubr.msk.f32.mxu0 %vm3106_vm0, %v3105_v0 }
 0x305   :  { %2797 = vmatprep.subr.bf16.mxu0 %v3107_v11 }
 0x308   :  { %2799 = vmatpush3.bf16.msra.mxu0 %v3264_v16 }
 0x309   :  { %2806 = vmatprep.subr.bf16.mxu0 %v3107_v11 }
 0x3d6   :  { %v511_v51 = vpop.f32.mrb[4].mxu0 }
 0x3d7   :  { %v516_v52 = vrot.slane %v511_v51, 6  ;;  %v2585_v53 = vpop.f32.mrb[5].mxu0 }
 0x3d9   :  { %v518_v54 = vadd.f32 %v516_v52, %v3289_v33 }
 0x3db   :  { %2908 = vtanh.f32 %v518_v54  ;;  %v2403_v56 = vmul.f32 -1.442695, %v518_v54 }
 0x3dd   :  { %2910 = vpow2.f32 %v2403_v56 }
 0x3e5   :  { %v2909_v55 = vpop.eup %2908 }
 0x3e6   :  { %531 = vrot.lane.b32.xlu0 %v2909_v55, %s3108_s0 }
 0x3e7   :  { %v2911_v57 = vpop.eup %2910 }
 0x3e8   :  { %v522_v58 = vadd.f32 1.0, %v2911_v57 }
 0x3ea   :  { %2912 = vrcp.f32 %v522_v58 }
 0x3f4   :  { %v2913_v59 = vpop.eup %2912 }
 0x3f5   :  { %v529_v63 = vmul.f32 %v2913_v59, %v527_v62 }
 0x458   :  { %v532_v60 = vpop.permute.xlu0 %531 }
 0x459   :  { %v534_v61 = vmul.f32 %v2913_v59, %v532_v60 }
 0x45b   :  { %536 = vrot.lane.b32.xlu1 %v534_v61, %s3109_s16 }
 0x4cd   :  { %v537_v1 = vpop.permute.xlu1 %536 }
 0x4ce   :  { %v539_v2 = vadd.f32 %v537_v1, %v529_v63 }
 0x4d0   :  { %2914 = vtanh.f32 %v539_v2  ;;  %v634_v24 = vrot.slane %v539_v2, 6 }
 0x4da   :  { %v2915_v5 = vpop.eup %2914 }
 0x4db   :  { %542 = vrot.lane.b32.xlu0 %v2915_v5, %s3108_s0 }
 0x54d   :  { %v543_v6 = vpop.permute.xlu0 %542 }
 0x54e   :  { %v545_v7 = vmul.f32 %v2913_v59, %v543_v6 }
 0x550   :  { %v547_v8 = vrot.slane %v545_v7, 2  ;;  %v1184_v31 = vsel %vm249_vm3, %v3295_v49, %v545_v7 }
 0x552   :  { %548 = vrot.lane.b32.xlu1 %v547_v8, %s3109_s16 }
 0x5c4   :  { %v549_v9 = vpop.permute.xlu1 %548 }
 0x5c5   :  { %2595 = vmatmul.mubr.msk.f32.vlgmr.msra.gmra.mrb[4].mxu1 %vm341_vm6, %v549_v9 }
 0x5c6   :  { %2802 = vmatpush3.bf16.msra.mxu1 %v3249_v12  ;;  %2616 = vmatprep.mubr.msk.f32.mxu1 %vm3106_vm0, %v3105_v0 }
 0x5c7   :  { %2803 = vmatprep.subr.bf16.mxu1 %v3107_v11 }
 0x5ca   :  { %2805 = vmatpush3.bf16.msra.mxu1 %v3264_v16 }
 0x5cb   :  { %2812 = vmatprep.subr.bf16.mxu1 %v3107_v11 }
 0x698   :  { %v618_v10 = vpop.f32.mrb[4].mxu1 }
 0x699   :  { %v623_v13 = vrot.slane %v618_v10, 4  ;;  %v2596_v14 = vpop.f32.mrb[5].mxu1 }
 0x69b   :  { %v625_v15 = vadd.f32 %v623_v13, %v3289_v33 }
 0x69d   :  { %2916 = vtanh.f32 %v625_v15  ;;  %v2405_v18 = vmul.f32 -1.442695, %v625_v15 }
 0x69f   :  { %2918 = vpow2.f32 %v2405_v18 }
 0x6a7   :  { %v2917_v17 = vpop.eup %2916 }
 0x6a8   :  { %638 = vrot.lane.b32.xlu0 %v2917_v17, %s3108_s0 }
 0x6a9   :  { %v2919_v19 = vpop.eup %2918 }
 0x6aa   :  { %v629_v20 = vadd.f32 1.0, %v2919_v19 }
 0x6ac   :  { %2920 = vrcp.f32 %v629_v20 }
 0x6b6   :  { %v2921_v21 = vpop.eup %2920 }
 0x6b7   :  { %v636_v25 = vmul.f32 %v2921_v21, %v634_v24 }
 0x71a   :  { %v639_v22 = vpop.permute.xlu0 %638 }
 0x71b   :  { %v641_v23 = vmul.f32 %v2921_v21, %v639_v22 }
 0x71d   :  { %643 = vrot.lane.b32.xlu1 %v641_v23, %s3109_s16 }
 0x78f   :  { %v644_v26 = vpop.permute.xlu1 %643 }
 0x790   :  { %v646_v27 = vadd.f32 %v644_v26, %v636_v25 }
 0x792   :  { %2922 = vtanh.f32 %v646_v27  ;;  %v741_v48 = vrot.slane %v646_v27, 6 }
 0x79c   :  { %v2923_v28 = vpop.eup %2922 }
 0x79d   :  { %649 = vrot.lane.b32.xlu0 %v2923_v28, %s3108_s0 }
 0x80f   :  { %v650_v29 = vpop.permute.xlu0 %649 }
 0x810   :  { %v652_v30 = vmul.f32 %v2921_v21, %v650_v29 }
 0x812   :  { %v654_v34 = vrot.slane %v652_v30, 4  ;;  %v1185_v35 = vsel %vm251_vm4, %v1184_v31, %v652_v30 }
 0x814   :  { %655 = vrot.lane.b32.xlu1 %v654_v34, %s3109_s16 }
 0x886   :  { %v656_v36 = vpop.permute.xlu1 %655 }
 0x887   :  { %2606 = vmatmul.mubr.msk.f32.vlgmr.msra.gmra.mrb[6].mxu0 %vm341_vm6, %v656_v36 }
 0x888   :  { %2808 = vmatpush3.bf16.msra.mxu0 %v3249_v12  ;;  %2627 = vmatprep.mubr.msk.f32.mxu0 %vm3106_vm0, %v3105_v0 }
 0x889   :  { %2809 = vmatprep.subr.bf16.mxu0 %v3107_v11 }
 0x88c   :  { %2811 = vmatpush3.bf16.msra.mxu0 %v3264_v16 }
 0x88d   :  { %2818 = vmatprep.subr.bf16.mxu0 %v3107_v11 }
 0x95a   :  { %v725_v37 = vpop.f32.mrb[6].mxu0 }
 0x95b   :  { %v730_v38 = vrot.slane %v725_v37, 2  ;;  %v2607_v39 = vpop.f32.mrb[7].mxu0 }
 0x95d   :  { %v732_v40 = vadd.f32 %v730_v38, %v3289_v33 }
 0x95f   :  { %2924 = vtanh.f32 %v732_v40  ;;  %v2407_v42 = vmul.f32 -1.442695, %v732_v40 }
 0x961   :  { %2926 = vpow2.f32 %v2407_v42 }
 0x969   :  { %v2925_v41 = vpop.eup %2924 }
 0x96a   :  { %745 = vrot.lane.b32.xlu0 %v2925_v41, %s3108_s0 }
 0x96b   :  { %v2927_v43 = vpop.eup %2926 }
 0x96c   :  { %v736_v44 = vadd.f32 1.0, %v2927_v43 }
 0x96e   :  { %2928 = vrcp.f32 %v736_v44 }
 0x978   :  { %v2929_v45 = vpop.eup %2928 }
 0x979   :  { %v743_v49 = vmul.f32 %v2929_v45, %v741_v48 }
 0x9dc   :  { %v746_v46 = vpop.permute.xlu0 %745 }
 0x9dd   :  { %v748_v47 = vmul.f32 %v2929_v45, %v746_v46 }
 0x9df   :  { %750 = vrot.lane.b32.xlu1 %v748_v47, %s3109_s16 }
 0xa51   :  { %v751_v50 = vpop.permute.xlu1 %750 }
 0xa52   :  { %v753_v51 = vadd.f32 %v751_v50, %v743_v49 }
 0xa54   :  { %2930 = vtanh.f32 %v753_v51  ;;  %v845_v6 = vrot.slane %v753_v51, 6 }
 0xa5e   :  { %v2931_v33 = vpop.eup %2930 }
 0xa5f   :  { %756 = vrot.lane.b32.xlu0 %v2931_v33, %s3108_s0 }
 0xad1   :  { %v757_v52 = vpop.permute.xlu0 %756 }
 0xad2   :  { %v759_v53 = vmul.f32 %v2929_v45, %v757_v52 }
 0xad4   :  { %v761_v54 = vrot.slane %v759_v53, 6  ;;  %v3338_v55 = vsel %vm253_vm5, %v1185_v35, %v759_v53 }
 0xad6   :  { %762 = vrot.lane.b32.xlu1 %v761_v54, %s3109_s16 }
 0xb48   :  { %v763_v56 = vpop.permute.xlu1 %762 }
 0xb49   :  { %2617 = vmatmul.mubr.msk.f32.vlgmr.msra.gmra.mrb[6].mxu1 %vm341_vm6, %v763_v56 }
 0xb4a   :  { %2814 = vmatpush3.bf16.msra.mxu1 %v3249_v12  ;;  %2638 = vmatprep.mubr.msk.f32.mxu1 %vm3106_vm0, %v3105_v0 }
 0xb4b   :  { %2815 = vmatprep.subr.bf16.mxu1 %v3107_v11 }
 0xb4e   :  { %2817 = vmatpush3.bf16.msra.mxu1 %v3264_v16 }
 0xb4f   :  { %2652 = vmatprep.subr.mxu1 %v3105_v0 }
 0xc1c   :  { %v832_v57 = vpop.f32.mrb[6].mxu1 }
 0xc1d   :  { %v836_v58 = vadd.f32 %v832_v57, %v3287_v32  ;;  %v2618_v59 = vpop.f32.mrb[7].mxu1 }
 0xc1f   :  { %2932 = vtanh.f32 %v836_v58  ;;  %v2409_v61 = vmul.f32 -1.442695, %v836_v58 }
 0xc21   :  { %2934 = vpow2.f32 %v2409_v61 }
 0xc29   :  { %v2933_v60 = vpop.eup %2932 }
 0xc2a   :  { %849 = vrot.lane.b32.xlu0 %v2933_v60, %s3108_s0 }
 0xc2b   :  { %v2935_v62 = vpop.eup %2934 }
 0xc2c   :  { %v840_v63 = vadd.f32 1.0, %v2935_v62 }
 0xc2e   :  { %2936 = vrcp.f32 %v840_v63 }
 0xc38   :  { %v2937_v1 = vpop.eup %2936 }
 0xc39   :  { %v847_v7 = vmul.f32 %v2937_v1, %v845_v6  ;;  %v1197_v6 = vld [vmem:[#allocation4 + $0x8] sm:$0xff] }
 0xc9c   :  { %v850_v2 = vpop.permute.xlu0 %849 }
 0xc9d   :  { %v852_v5 = vmul.f32 %v2937_v1, %v850_v2 }
 0xc9f   :  { %854 = vrot.lane.b32.xlu1 %v852_v5, %s3109_s16 }
 0xd11   :  { %v855_v8 = vpop.permute.xlu1 %854 }
 0xd12   :  { %v857_v9 = vadd.f32 %v855_v8, %v847_v7 }
 0xd14   :  { %2938 = vtanh.f32 %v857_v9 }
 0xd1e   :  { %v2939_v10 = vpop.eup %2938 }
 0xd1f   :  { %860 = vrot.lane.b32.xlu0 %v2939_v10, %s3108_s0 }
 0xd91   :  { %v861_v13 = vpop.permute.xlu0 %860 }
 0xd92   :  { %v3352_v14 = vmul.f32 %v2937_v1, %v861_v13 }
 0xd94   :  { %865 = vrot.lane.b32.xlu1 %v3352_v14, %s3109_s16 }
 0xe06   :  { %v866_v15 = vpop.permute.xlu1 %865 }
 0xe07   :  { %2628 = vmatmul.mubr.msk.f32.vlgmr.msra.gmra.mrb[8].mxu0 %vm341_vm6, %v866_v15 }
 0xe08   :  { %2820 = vmatpush3.bf16.msra.mxu0 %v3249_v12  ;;  %2649 = vmatprep.mubr.msk.f32.mxu0 %vm3106_vm0, %v3105_v0 }
 0xe09   :  { %2821 = vmatprep.subr.bf16.mxu0 %v3107_v11 }
 0xe0c   :  { %2823 = vmatpush3.bf16.msra.mxu0 %v3264_v16  ;;  %v951_v16 = vrot.slane %v857_v9, 6 }
 0xe0d   :  { %2657 = vmatprep.subr.mxu0 %v3105_v0 }
 0xeda   :  { %v935_v17 = vpop.f32.mrb[8].mxu0 }
 0xedb   :  { %v940_v18 = vrot.slane %v935_v17, 6  ;;  %v2629_v19 = vpop.f32.mrb[9].mxu0  ;;  %v1195_v17 = vld [vmem:[#allocation2 + $0x8] sm:$0xff] }
 0xedd   :  { %v942_v20 = vadd.f32 %v940_v18, %v3287_v32  ;;  %v1190_v18 = vld [vmem:[%s3577_s4] sm:$0xff] }
 0xedf   :  { %2940 = vtanh.f32 %v942_v20  ;;  %v2411_v22 = vmul.f32 -1.442695, %v942_v20  ;;  %v2422_v20 = vld [vmem:[%s3578_s5 + $0x28] sm:$0xff] }
 0xee1   :  { %2942 = vpow2.f32 %v2411_v22 }
 0xee9   :  { %v2941_v21 = vpop.eup %2940 }
 0xeea   :  { %955 = vrot.lane.b32.xlu0 %v2941_v21, %s3108_s0  ;;  %v1192_v21 = vld [vmem:[%s3577_s4 + $0x10] sm:$0xff] }
 0xeeb   :  { %v2943_v12 = vpop.eup %2942 }
 0xeec   :  { %v946_v23 = vadd.f32 1.0, %v2943_v12  ;;  %v1193_v12 = vld [vmem:[%s3577_s4 + $0x18] sm:$0xff] }
 0xeee   :  { %2944 = vrcp.f32 %v946_v23  ;;  %v2423_v23 = vld [vmem:[%s3578_s5 + $0x30] sm:$0xff] }
 0xef8   :  { %v2945_v24 = vpop.eup %2944 }
 0xef9   :  { %v953_v27 = vmul.f32 %v2945_v24, %v951_v16 }
 0xf5c   :  { %v956_v25 = vpop.permute.xlu0 %955 }
 0xf5d   :  { %v958_v26 = vmul.f32 %v2945_v24, %v956_v25  ;;  %v2828_v25 = vpack.c.bf16 %v1193_v12, %v1192_v21 }
 0xf5f   :  { %960 = vrot.lane.b32.xlu1 %v958_v26, %s3109_s16 }
 0xfd1   :  { %v961_v28 = vpop.permute.xlu1 %960 }
 0xfd2   :  { %v963_v29 = vadd.f32 %v961_v28, %v953_v27 }
 0xfd4   :  { %2946 = vtanh.f32 %v963_v29  ;;  %v1058_v48 = vrot.slane %v963_v29, 6 }
 0xfde   :  { %v2947_v30 = vpop.eup %2946 }
 0xfdf   :  { %966 = vrot.lane.b32.xlu0 %v2947_v30, %s3108_s0 }
0x1051   :  { %v967_v31 = vpop.permute.xlu0 %966 }
0x1052   :  { %v969_v34 = vmul.f32 %v2945_v24, %v967_v31  ;;  %v2424_v24 = vld [vmem:[%s3578_s5 + $0x38] sm:$0xff] }
0x1054   :  { %v971_v35 = vrot.slane %v969_v34, 2  ;;  %v1187_v54 = vsel %vm249_vm3, %v3352_v14, %v969_v34 }
0x1056   :  { %972 = vrot.lane.b32.xlu1 %v971_v35, %s3109_s16 }
0x10c8   :  { %v973_v36 = vpop.permute.xlu1 %972 }
0x10c9   :  { %2639 = vmatmul.mubr.msk.f32.vlgmr.msra.gmra.mrb[8].mxu1 %vm341_vm6, %v973_v36 }
0x10ca   :  { %2654 = vmatprep.mubr.msk.f32.mxu1 %vm3106_vm0, %v3105_v0  ;;  %2653 = vmatpush3.msra.mxu1 %v1197_v6 }
0x10cd   :  { %2655 = vmatmul.mubr.msk.f32.vlgmr.msra.gmra.mrb[10].mxu1 %vm87_vm1, %v3222_v3  ;;  %v1191_v3 = vld [vmem:[%s3577_s4 + $0x8] sm:$0xff] }
0x10ce   :  { %v2824_v19 = vpack.c.bf16 %v1191_v3, %v1190_v18 }
0x10d0   :  { %2825 = vmatprep.subr.bf16.mxu1 %v2824_v19 }
0x10d1   :  { %2827 = vmatpush3.bf16.msra.mxu1 %v2824_v19 }
0x10d2   :  { %2829 = vmatprep.subr.bf16.mxu1 %v2828_v25 }
0x10d5   :  { %2831 = vmatpush3.bf16.msra.mxu1 %v2828_v25 }
0x10d6   :  { %2838 = vmatprep.subr.bf16.mxu1 %v3107_v11 }
0x119c   :  { %v1042_v37 = vpop.f32.mrb[8].mxu1 }
0x119d   :  { %v1047_v38 = vrot.slane %v1042_v37, 4  ;;  %v2640_v39 = vpop.f32.mrb[9].mxu1 }
0x119e   :  { %v2418_v39 = vld [vmem:[#allocation6 + $0x1] ss:$0 sm:$0xff] }
0x119f   :  { %v1049_v40 = vadd.f32 %v1047_v38, %v3287_v32 }
0x11a0   :  { %v1264_v16 = vpop.f32.mrb[10].mxu1 }
0x11a1   :  { %2948 = vtanh.f32 %v1049_v40  ;;  %v2413_v42 = vmul.f32 -1.442695, %v1049_v40  ;;  %v2656_v27 = vpop.f32.mrb[11].mxu1 }
0x11a3   :  { %2950 = vpow2.f32 %v2413_v42 }
0x11ab   :  { %v2949_v41 = vpop.eup %2948 }
0x11ac   :  { %1062 = vrot.lane.b32.xlu0 %v2949_v41, %s3108_s0 }
0x11ad   :  { %v2951_v43 = vpop.eup %2950 }
0x11ae   :  { %v1053_v44 = vadd.f32 1.0, %v2951_v43 }
0x11b0   :  { %2952 = vrcp.f32 %v1053_v44 }
0x11ba   :  { %v2953_v45 = vpop.eup %2952 }
0x11bb   :  { %v1060_v49 = vmul.f32 %v2953_v45, %v1058_v48 }
0x121e   :  { %v1063_v46 = vpop.permute.xlu0 %1062 }
0x121f   :  { %v1065_v47 = vmul.f32 %v2953_v45, %v1063_v46 }
0x1221   :  { %1067 = vrot.lane.b32.xlu1 %v1065_v47, %s3109_s16 }
0x1293   :  { %v1068_v50 = vpop.permute.xlu1 %1067 }
0x1294   :  { %v1070_v51 = vadd.f32 %v1068_v50, %v1060_v49 }
0x1296   :  { %2954 = vtanh.f32 %v1070_v51 }
0x12a0   :  { %v2955_v33 = vpop.eup %2954 }
0x12a1   :  { %1073 = vrot.lane.b32.xlu0 %v2955_v33, %s3108_s0 }
0x1313   :  { %v1074_v52 = vpop.permute.xlu0 %1073 }
0x1314   :  { %v1076_v53 = vmul.f32 %v2953_v45, %v1074_v52 }
0x1316   :  { %v1078_v56 = vrot.slane %v1076_v53, 4  ;;  %v3378_v57 = vsel %vm251_vm4, %v1187_v54, %v1076_v53 }
0x1318   :  { %1079 = vrot.lane.b32.xlu1 %v1078_v56, %s3109_s16 }
0x138a   :  { %v1080_v58 = vpop.permute.xlu1 %1079 }
0x138b   :  { %2650 = vmatmul.mubr.msk.f32.vlgmr.msra.gmra.mrb[10].mxu0 %vm341_vm6, %v1080_v58 }
0x138c   :  { %2659 = vmatprep.mubr.msk.f32.mxu0 %vm3106_vm0, %v3105_v0  ;;  %2658 = vmatpush3.msra.mxu0 %v1195_v17 }
0x138d   :  { %2832 = vmatprep.subr.bf16.mxu0 %v3107_v11 }
0x138f   :  { %2660 = vmatmul.mubr.msk.f32.vlgmr.msra.gmra.mrb[12].mxu0 %vm87_vm1, %v3227_v4  ;;  %v3424_v4 = vpack.c.bf16 %v2424_v24, %v2423_v23 }
0x1390   :  { %2681 = vmatprep.mubr.msk.f32.mxu0 %vm3106_vm0, %v3105_v0 }
0x145e   :  { %v1149_v59 = vpop.f32.mrb[10].mxu0 }
0x145f   :  { %v1154_v60 = vrot.slane %v1149_v59, 2  ;;  %v2651_v61 = vpop.f32.mrb[11].mxu0 }
0x1461   :  { %v1156_v62 = vadd.f32 %v1154_v60, %v3287_v32  ;;  %v1165_v32 = vrot.slane %v1070_v51, 6 }
0x1462   :  { %v1334_v31 = vpop.f32.mrb[12].mxu0 }
0x1463   :  { %2956 = vtanh.f32 %v1156_v62  ;;  %v2415_v1 = vmul.f32 -1.442695, %v1156_v62  ;;  %v1335_v34 = vadd.f32 %v1334_v31, %v1264_v16  ;;  %v2661_v35 = vpop.f32.mrb[13].mxu0 }
0x1465   :  { %2958 = vpow2.f32 %v2415_v1  ;;  %v1346_v40 = vadd.f32 %v2418_v39, %v1335_v34 }
0x1467   :  { %v1348_v41 = vrot.slane %v1346_v40, 6  ;;  %v1350_v42 = vrot.slane %v1346_v40, 4  ;;  %v1352_v44 = vrot.slane %v1346_v40, 2 }
0x1469   :  { %v1354_v43 = vsel %vm249_vm3, %v1346_v40, %v1348_v41 }
0x146a   :  { %v1355_v45 = vsel %vm251_vm4, %v1354_v43, %v1350_v42 }
0x146b   :  { %v1356_v46 = vsel %vm253_vm5, %v1355_v45, %v1352_v44 }
0x146d   :  { %v2957_v63 = vpop.eup %2956 }
0x146e   :  { %1169 = vrot.lane.b32.xlu0 %v2957_v63, %s3108_s0 }
0x146f   :  { %v2959_v2 = vpop.eup %2958 }
0x1470   :  { %v1160_v5 = vadd.f32 1.0, %v2959_v2 }
0x1472   :  { %2960 = vrcp.f32 %v1160_v5 }
0x147c   :  { %v2961_v7 = vpop.eup %2960 }
0x147d   :  { %v1167_v10 = vmul.f32 %v2961_v7, %v1165_v32 }
0x14e0   :  { %v1170_v8 = vpop.permute.xlu0 %1169 }
0x14e1   :  { %v1172_v9 = vmul.f32 %v2961_v7, %v1170_v8 }
0x14e3   :  { %1174 = vrot.lane.b32.xlu1 %v1172_v9, %s3109_s16 }
0x14e7   :  { %1359 = vrot.lane.b32.xlu1 %v3338_v55, %s3109_s16  ;;  %v2421_v55 = vld [vmem:[%s3578_s5 + $0x20] sm:$0xff] }
0x14e8   :  { %v3410_v22 = vpack.c.bf16 %v2422_v20, %v2421_v55 }
0x14ea   :  { %2834 = vmatpush3.bf16.msra.mxu0 %v3410_v22 }
0x14eb   :  { %2835 = vmatprep.subr.bf16.mxu0 %v3107_v11 }
0x14ee   :  { %2837 = vmatpush3.bf16.msra.mxu0 %v3424_v4 }
0x14ef   :  { %2844 = vmatprep.subr.bf16.mxu0 %v3107_v11 }
0x14f1   :  { %2682 = vmatmul.mubr.f32.vlgmr.msra.gmra.mrb[14].mxu0 %v3105_v0 }
0x14f2   :  { %2846 = vmatpush3.bf16.msra.mxu0 %v3410_v22  ;;  %2703 = vmatprep.mubr.msk.f32.mxu0 %vm3106_vm0, %v3105_v0 }
0x14f3   :  { %2847 = vmatprep.subr.bf16.mxu0 %v3107_v11 }
0x14f6   :  { %2849 = vmatpush3.bf16.msra.mxu0 %v3424_v4 }
0x14f7   :  { %2856 = vmatprep.subr.bf16.mxu0 %v3107_v11 }
0x1555   :  { %v1175_v13 = vpop.permute.xlu1 %1174 }
0x1556   :  { %v1177_v14 = vadd.f32 %v1175_v13, %v1167_v10 }
0x1558   :  { %2962 = vtanh.f32 %v1177_v14 }
0x1559   :  { %v1360_v15 = vpop.permute.xlu1 %1359 }
0x155a   :  { %2670 = vmatprep.mubr.msk.f32.mxu1 %vm341_vm6, %v1360_v15 }
0x1562   :  { %v2963_v26 = vpop.eup %2962 }
0x1563   :  { %1180 = vrot.lane.b32.xlu0 %v2963_v26, %s3108_s0 }
0x15c4   :  { %v1513_v37 = vpop.f32.mrb[14].mxu0 }
0x15c5   :  { %v2683_v38 = vpop.f32.mrb[15].mxu0 }
0x15d5   :  { %v1181_v28 = vpop.permute.xlu0 %1180 }
0x15d6   :  { %v1183_v29 = vmul.f32 %v2961_v7, %v1181_v28 }
0x15d8   :  { %v1189_v30 = vsel %vm253_vm5, %v3378_v57, %v1183_v29 }
0x15d9   :  { %1361 = vrot.lane.b32.xlu0 %v1189_v30, %s3109_s16 }
0x164b   :  { %v1362_v36 = vpop.permute.xlu0 %1361 }
0x164c   :  { %2671 = vmatmul.mubr.msk.f32.vlgmr.msra.gmra.mrb[12].mxu1 %vm341_vm6, %v1362_v36 }
0x164d   :  { %2840 = vmatpush3.bf16.msra.mxu1 %v3410_v22  ;;  %2692 = vmatprep.mubr.msk.f32.mxu1 %vm3106_vm0, %v3105_v0 }
0x164e   :  { %2841 = vmatprep.subr.bf16.mxu1 %v3107_v11 }
0x1651   :  { %2843 = vmatpush3.bf16.msra.mxu1 %v3424_v4 }
0x1652   :  { %2850 = vmatprep.subr.bf16.mxu1 %v3107_v11 }
0x171f   :  { %v2672_v47 = vpop.f32.mrb[12].mxu1 }
0x1720   :  { %v3451_v48 = vadd.f32 %v2672_v47, %v1356_v46  ;;  %v1433_v49 = vpop.f32.mrb[13].mxu1 }
0x1721   :  { %v3453_v50 = vadd.f32 %v1433_v49, %v1356_v46 }
0x1723   :  { %v1517_v51 = vadd.f32 %v1513_v37, %v3453_v50 }
0x1725   :  { %2964 = vtanh.f32 %v1517_v51  ;;  %v2425_v52 = vmul.f32 -1.442695, %v1517_v51 }
0x1727   :  { %2966 = vpow2.f32 %v2425_v52 }
0x172f   :  { %v2965_v33 = vpop.eup %2964 }
0x1730   :  { %1527 = vrot.lane.b32.xlu1 %v2965_v33, %s3108_s0 }
0x1731   :  { %v2967_v53 = vpop.eup %2966 }
0x1732   :  { %v1521_v54 = vadd.f32 1.0, %v2967_v53 }
0x1734   :  { %2968 = vrcp.f32 %v1521_v54 }
0x173e   :  { %v2969_v56 = vpop.eup %2968 }
0x173f   :  { %v1525_v59 = vmul.f32 0.0, %v2969_v56 }
0x17a2   :  { %v1528_v57 = vpop.permute.xlu1 %1527 }
0x17a3   :  { %v1530_v58 = vmul.f32 %v2969_v56, %v1528_v57 }
0x17a5   :  { %1532 = vrot.lane.b32.xlu0 %v1530_v58, %s3109_s16 }
0x1817   :  { %v1533_v60 = vpop.permute.xlu0 %1532 }
0x1818   :  { %v1535_v61 = vadd.f32 %v1533_v60, %v1525_v59 }
0x181a   :  { %2970 = vtanh.f32 %v1535_v61  ;;  %v1629_v18 = vrot.slane %v1535_v61, 6 }
0x1824   :  { %v2971_v62 = vpop.eup %2970 }
0x1825   :  { %1538 = vrot.lane.b32.xlu1 %v2971_v62, %s3108_s0 }
0x1897   :  { %v1539_v63 = vpop.permute.xlu1 %1538 }
0x1898   :  { %v3459_v1 = vmul.f32 %v2969_v56, %v1539_v63 }
0x189a   :  { %1543 = vrot.lane.b32.xlu0 %v3459_v1, %s3109_s16 }
0x190c   :  { %v1544_v2 = vpop.permute.xlu0 %1543 }
0x190d   :  { %2693 = vmatmul.mubr.msk.f32.vlgmr.msra.gmra.mrb[14].mxu1 %vm341_vm6, %v1544_v2 }
0x190e   :  { %2852 = vmatpush3.bf16.msra.mxu1 %v3410_v22  ;;  %2714 = vmatprep.mubr.msk.f32.mxu1 %vm3106_vm0, %v3105_v0 }
0x190f   :  { %2853 = vmatprep.subr.bf16.mxu1 %v3107_v11 }
0x1912   :  { %2855 = vmatpush3.bf16.msra.mxu1 %v3424_v4 }
0x1913   :  { %2862 = vmatprep.subr.bf16.mxu1 %v3107_v11 }
0x19e0   :  { %v1613_v5 = vpop.f32.mrb[14].mxu1 }
0x19e1   :  { %v1618_v6 = vrot.slane %v1613_v5, 6  ;;  %v2694_v7 = vpop.f32.mrb[15].mxu1 }
0x19e3   :  { %v1620_v8 = vadd.f32 %v1618_v6, %v3453_v50 }
0x19e5   :  { %2972 = vtanh.f32 %v1620_v8  ;;  %v2427_v32 = vmul.f32 -1.442695, %v1620_v8 }
0x19e7   :  { %2974 = vpow2.f32 %v2427_v32 }
0x19ef   :  { %v2973_v9 = vpop.eup %2972 }
0x19f0   :  { %1633 = vrot.lane.b32.xlu1 %v2973_v9, %s3108_s0 }
0x19f1   :  { %v2975_v10 = vpop.eup %2974 }
0x19f2   :  { %v1624_v13 = vadd.f32 1.0, %v2975_v10 }
0x19f4   :  { %2976 = vrcp.f32 %v1624_v13 }
0x19fe   :  { %v2977_v14 = vpop.eup %2976 }
0x19ff   :  { %v1631_v3 = vmul.f32 %v2977_v14, %v1629_v18 }
0x1a62   :  { %v1634_v15 = vpop.permute.xlu1 %1633 }
0x1a63   :  { %v1636_v17 = vmul.f32 %v2977_v14, %v1634_v15 }
0x1a65   :  { %1638 = vrot.lane.b32.xlu0 %v1636_v17, %s3109_s16 }
0x1ad7   :  { %v1639_v19 = vpop.permute.xlu0 %1638 }
0x1ad8   :  { %v1641_v55 = vadd.f32 %v1639_v19, %v1631_v3 }
0x1ada   :  { %2978 = vtanh.f32 %v1641_v55  ;;  %v1736_v37 = vrot.slane %v1641_v55, 6 }
0x1ae4   :  { %v2979_v20 = vpop.eup %2978 }
0x1ae5   :  { %1644 = vrot.lane.b32.xlu1 %v2979_v20, %s3108_s0 }
0x1b57   :  { %v1645_v21 = vpop.permute.xlu1 %1644 }
0x1b58   :  { %v1647_v12 = vmul.f32 %v2977_v14, %v1645_v21 }
0x1b5a   :  { %v1649_v23 = vrot.slane %v1647_v12, 2  ;;  %v2286_v44 = vsel %vm249_vm3, %v3459_v1, %v1647_v12 }
0x1b5c   :  { %1650 = vrot.lane.b32.xlu0 %v1649_v23, %s3109_s16 }
0x1bce   :  { %v1651_v24 = vpop.permute.xlu0 %1650 }
0x1bcf   :  { %2704 = vmatmul.mubr.msk.f32.vlgmr.msra.gmra.mrb[16].mxu0 %vm341_vm6, %v1651_v24 }
0x1bd0   :  { %2858 = vmatpush3.bf16.msra.mxu0 %v3410_v22  ;;  %2725 = vmatprep.mubr.msk.f32.mxu0 %vm3106_vm0, %v3105_v0 }
0x1bd1   :  { %2859 = vmatprep.subr.bf16.mxu0 %v3107_v11 }
0x1bd4   :  { %2861 = vmatpush3.bf16.msra.mxu0 %v3424_v4 }
0x1bd5   :  { %2868 = vmatprep.subr.bf16.mxu0 %v3107_v11 }
0x1ca2   :  { %v1720_v25 = vpop.f32.mrb[16].mxu0 }
0x1ca3   :  { %v1725_v26 = vrot.slane %v1720_v25, 4  ;;  %v2705_v16 = vpop.f32.mrb[17].mxu0 }
0x1ca5   :  { %v1727_v27 = vadd.f32 %v1725_v26, %v3453_v50 }
0x1ca7   :  { %2980 = vtanh.f32 %v1727_v27  ;;  %v2429_v29 = vmul.f32 -1.442695, %v1727_v27 }
0x1ca9   :  { %2982 = vpow2.f32 %v2429_v29 }
0x1cb1   :  { %v2981_v28 = vpop.eup %2980 }
0x1cb2   :  { %1740 = vrot.lane.b32.xlu1 %v2981_v28, %s3108_s0 }
0x1cb3   :  { %v2983_v30 = vpop.eup %2982 }
0x1cb4   :  { %v1731_v31 = vadd.f32 1.0, %v2983_v30 }
0x1cb6   :  { %2984 = vrcp.f32 %v1731_v31 }
0x1cc0   :  { %v2985_v34 = vpop.eup %2984 }
0x1cc1   :  { %v1738_v38 = vmul.f32 %v2985_v34, %v1736_v37 }
0x1d24   :  { %v1741_v35 = vpop.permute.xlu1 %1740 }
0x1d25   :  { %v1743_v36 = vmul.f32 %v2985_v34, %v1741_v35 }
0x1d27   :  { %1745 = vrot.lane.b32.xlu0 %v1743_v36, %s3109_s16 }
0x1d99   :  { %v1746_v39 = vpop.permute.xlu0 %1745 }
0x1d9a   :  { %v1748_v40 = vadd.f32 %v1746_v39, %v1738_v38 }
0x1d9c   :  { %2986 = vtanh.f32 %v1748_v40  ;;  %v1843_v61 = vrot.slane %v1748_v40, 6 }
0x1da6   :  { %v2987_v41 = vpop.eup %2986 }
0x1da7   :  { %1751 = vrot.lane.b32.xlu1 %v2987_v41, %s3108_s0 }
0x1e19   :  { %v1752_v42 = vpop.permute.xlu1 %1751 }
0x1e1a   :  { %v1754_v43 = vmul.f32 %v2985_v34, %v1752_v42 }
0x1e1c   :  { %v1756_v45 = vrot.slane %v1754_v43, 4  ;;  %v2287_v46 = vsel %vm251_vm4, %v2286_v44, %v1754_v43 }
0x1e1e   :  { %1757 = vrot.lane.b32.xlu0 %v1756_v45, %s3109_s16 }
0x1e90   :  { %v1758_v47 = vpop.permute.xlu0 %1757 }
0x1e91   :  { %2715 = vmatmul.mubr.msk.f32.vlgmr.msra.gmra.mrb[16].mxu1 %vm341_vm6, %v1758_v47 }
0x1e92   :  { %2864 = vmatpush3.bf16.msra.mxu1 %v3410_v22  ;;  %2736 = vmatprep.mubr.msk.f32.mxu1 %vm3106_vm0, %v3105_v0 }
0x1e93   :  { %2865 = vmatprep.subr.bf16.mxu1 %v3107_v11 }
0x1e96   :  { %2867 = vmatpush3.bf16.msra.mxu1 %v3424_v4 }
0x1e97   :  { %2874 = vmatprep.subr.bf16.mxu1 %v3107_v11 }
0x1f64   :  { %v1827_v49 = vpop.f32.mrb[16].mxu1 }
0x1f65   :  { %v1832_v51 = vrot.slane %v1827_v49, 2  ;;  %v2716_v33 = vpop.f32.mrb[17].mxu1 }
0x1f67   :  { %v1834_v52 = vadd.f32 %v1832_v51, %v3453_v50 }
0x1f69   :  { %2988 = vtanh.f32 %v1834_v52  ;;  %v2431_v54 = vmul.f32 -1.442695, %v1834_v52 }
0x1f6b   :  { %2990 = vpow2.f32 %v2431_v54 }
0x1f73   :  { %v2989_v53 = vpop.eup %2988 }
0x1f74   :  { %1847 = vrot.lane.b32.xlu1 %v2989_v53, %s3108_s0 }
0x1f75   :  { %v2991_v56 = vpop.eup %2990 }
0x1f76   :  { %v1838_v57 = vadd.f32 1.0, %v2991_v56 }
0x1f78   :  { %2992 = vrcp.f32 %v1838_v57 }
0x1f82   :  { %v2993_v58 = vpop.eup %2992 }
0x1f83   :  { %v1845_v62 = vmul.f32 %v2993_v58, %v1843_v61 }
0x1fe6   :  { %v1848_v59 = vpop.permute.xlu1 %1847 }
0x1fe7   :  { %v1850_v60 = vmul.f32 %v2993_v58, %v1848_v59 }
0x1fe9   :  { %1852 = vrot.lane.b32.xlu0 %v1850_v60, %s3109_s16 }
0x205b   :  { %v1853_v63 = vpop.permute.xlu0 %1852 }
0x205c   :  { %v1855_v1 = vadd.f32 %v1853_v63, %v1845_v62 }
0x205e   :  { %2994 = vtanh.f32 %v1855_v1  ;;  %v1947_v55 = vrot.slane %v1855_v1, 6 }
0x2068   :  { %v2995_v50 = vpop.eup %2994 }
0x2069   :  { %1858 = vrot.lane.b32.xlu1 %v2995_v50, %s3108_s0 }
0x20db   :  { %v1859_v2 = vpop.permute.xlu1 %1858 }
0x20dc   :  { %v1861_v5 = vmul.f32 %v2993_v58, %v1859_v2 }
0x20de   :  { %v1863_v6 = vrot.slane %v1861_v5, 6  ;;  %v3502_v7 = vsel %vm253_vm5, %v2287_v46, %v1861_v5 }
0x20e0   :  { %1864 = vrot.lane.b32.xlu0 %v1863_v6, %s3109_s16 }
0x2152   :  { %v1865_v8 = vpop.permute.xlu0 %1864 }
0x2153   :  { %2726 = vmatmul.mubr.msk.f32.vlgmr.msra.gmra.mrb[18].mxu0 %vm341_vm6, %v1865_v8 }
0x2154   :  { %2870 = vmatpush3.bf16.msra.mxu0 %v3410_v22  ;;  %2747 = vmatprep.mubr.msk.f32.mxu0 %vm3106_vm0, %v3105_v0 }
0x2155   :  { %2871 = vmatprep.subr.bf16.mxu0 %v3107_v11 }
0x2158   :  { %2873 = vmatpush3.bf16.msra.mxu0 %v3424_v4 }
0x2226   :  { %v1934_v9 = vpop.f32.mrb[18].mxu0 }
0x2227   :  { %v1938_v32 = vadd.f32 %v1934_v9, %v3451_v48  ;;  %v2727_v10 = vpop.f32.mrb[19].mxu0 }
0x2229   :  { %2996 = vtanh.f32 %v1938_v32  ;;  %v2433_v14 = vmul.f32 -1.442695, %v1938_v32 }
0x222b   :  { %2998 = vpow2.f32 %v2433_v14 }
0x2233   :  { %v2997_v13 = vpop.eup %2996 }
0x2234   :  { %1951 = vrot.lane.b32.xlu1 %v2997_v13, %s3108_s0 }
0x2235   :  { %v2999_v15 = vpop.eup %2998 }
0x2236   :  { %v1942_v17 = vadd.f32 1.0, %v2999_v15 }
0x2238   :  { %3000 = vrcp.f32 %v1942_v17 }
0x2242   :  { %v3001_v18 = vpop.eup %3000 }
0x2243   :  { %v1949_v20 = vmul.f32 %v3001_v18, %v1947_v55 }
0x22a6   :  { %v1952_v3 = vpop.permute.xlu1 %1951 }
0x22a7   :  { %v1954_v19 = vmul.f32 %v3001_v18, %v1952_v3 }
0x22a9   :  { %1956 = vrot.lane.b32.xlu0 %v1954_v19, %s3109_s16 }
0x231b   :  { %v1957_v21 = vpop.permute.xlu0 %1956 }
0x231c   :  { %v1959_v12 = vadd.f32 %v1957_v21, %v1949_v20 }
0x231e   :  { %3002 = vtanh.f32 %v1959_v12 }
0x2328   :  { %v3003_v23 = vpop.eup %3002 }
0x2329   :  { %1962 = vrot.lane.b32.xlu1 %v3003_v23, %s3108_s0  ;;  %v2293_v23 = vld [vmem:[%s3582_s9 + $0x8] sm:$0xff] }
0x239b   :  { %v1963_v24 = vpop.permute.xlu1 %1962 }
0x239c   :  { %v3515_v25 = vmul.f32 %v3001_v18, %v1963_v24  ;;  %v2294_v24 = vld [vmem:[%s3582_s9 + $0x10] sm:$0xff] }
0x239e   :  { %1967 = vrot.lane.b32.xlu0 %v3515_v25, %s3109_s16 }
0x2410   :  { %v1968_v26 = vpop.permute.xlu0 %1967 }
0x2411   :  { %2737 = vmatmul.mubr.msk.f32.vlgmr.msra.gmra.mrb[18].mxu1 %vm341_vm6, %v1968_v26 }
0x2412   :  { %2876 = vmatpush3.bf16.msra.mxu1 %v3410_v22  ;;  %2758 = vmatprep.mubr.msk.f32.mxu1 %vm3106_vm0, %v3105_v0 }
0x2413   :  { %2877 = vmatprep.subr.bf16.mxu1 %v3107_v11  ;;  %v2053_v11 = vrot.slane %v1959_v12, 6  ;;  %v2292_v12 = vld [vmem:[%s3582_s9] sm:$0xff] }
0x2416   :  { %2879 = vmatpush3.bf16.msra.mxu1 %v3424_v4 }
0x24e4   :  { %v2037_v16 = vpop.f32.mrb[18].mxu1 }
0x24e5   :  { %v2042_v27 = vrot.slane %v2037_v16, 6  ;;  %v2738_v28 = vpop.f32.mrb[19].mxu1 }
0x24e7   :  { %v2044_v29 = vadd.f32 %v2042_v27, %v3451_v48 }
0x24e9   :  { %3004 = vtanh.f32 %v2044_v29  ;;  %v2435_v31 = vmul.f32 -1.442695, %v2044_v29 }
0x24eb   :  { %3006 = vpow2.f32 %v2435_v31  ;;  %v2440_v31 = vld [vmem:[%s3583_s10] ss:$0 sm:$0xff] }
0x24f3   :  { %v3005_v30 = vpop.eup %3004 }
0x24f4   :  { %2057 = vrot.lane.b32.xlu1 %v3005_v30, %s3108_s0 }
0x24f5   :  { %v3007_v34 = vpop.eup %3006 }
0x24f6   :  { %v2048_v22 = vadd.f32 1.0, %v3007_v34 }
0x24f8   :  { %3008 = vrcp.f32 %v2048_v22 }
0x2502   :  { %v3009_v35 = vpop.eup %3008 }
0x2503   :  { %v2055_v4 = vmul.f32 %v3009_v35, %v2053_v11 }
0x2566   :  { %v2058_v0 = vpop.permute.xlu1 %2057 }
0x2567   :  { %v2060_v36 = vmul.f32 %v3009_v35, %v2058_v0 }
0x2569   :  { %2062 = vrot.lane.b32.xlu0 %v2060_v36, %s3109_s16 }
0x25db   :  { %v2063_v37 = vpop.permute.xlu0 %2062 }
0x25dc   :  { %v2065_v38 = vadd.f32 %v2063_v37, %v2055_v4 }
0x25de   :  { %3010 = vtanh.f32 %v2065_v38  ;;  %v2160_v57 = vrot.slane %v2065_v38, 6 }
0x25e8   :  { %v3011_v39 = vpop.eup %3010 }
0x25e9   :  { %2068 = vrot.lane.b32.xlu1 %v3011_v39, %s3108_s0 }
0x265b   :  { %v2069_v40 = vpop.permute.xlu1 %2068 }
0x265c   :  { %v2071_v41 = vmul.f32 %v3009_v35, %v2069_v40 }
0x265e   :  { %v2073_v42 = vrot.slane %v2071_v41, 2  ;;  %v2289_v1 = vsel %vm249_vm3, %v3515_v25, %v2071_v41  ;;  %v2295_v25 = vld [vmem:[%s3582_s9 + $0x18] sm:$0xff] }
0x265f   :  { %v2884_v26 = vpack.c.bf16 %v2295_v25, %v2294_v24 }
0x2660   :  { %2074 = vrot.lane.b32.xlu0 %v2073_v42, %s3109_s16 }
0x26d2   :  { %v2075_v43 = vpop.permute.xlu0 %2074 }
0x26d3   :  { %2748 = vmatmul.mubr.msk.f32.vlgmr.msra.gmra.mrb[20].mxu0 %vm341_vm6, %v2075_v43 }
0x27a6   :  { %v2144_v44 = vpop.f32.mrb[20].mxu0 }
0x27a7   :  { %v2149_v45 = vrot.slane %v2144_v44, 4  ;;  %v2749_v46 = vpop.f32.mrb[21].mxu0 }
0x27a9   :  { %v2151_v47 = vadd.f32 %v2149_v45, %v3451_v48 }
0x27ab   :  { %3012 = vtanh.f32 %v2151_v47  ;;  %v2437_v51 = vmul.f32 -1.442695, %v2151_v47 }
0x27ad   :  { %3014 = vpow2.f32 %v2437_v51 }
0x27b5   :  { %v3013_v49 = vpop.eup %3012 }
0x27b6   :  { %2164 = vrot.lane.b32.xlu1 %v3013_v49, %s3108_s0 }
0x27b7   :  { %v3015_v33 = vpop.eup %3014 }
0x27b8   :  { %v2155_v52 = vadd.f32 1.0, %v3015_v33 }
0x27ba   :  { %3016 = vrcp.f32 %v2155_v52 }
0x27c4   :  { %v3017_v53 = vpop.eup %3016 }
0x27c5   :  { %v2162_v58 = vmul.f32 %v3017_v53, %v2160_v57 }
0x2828   :  { %v2165_v54 = vpop.permute.xlu1 %2164 }
0x2829   :  { %v2167_v56 = vmul.f32 %v3017_v53, %v2165_v54 }
0x282b   :  { %2169 = vrot.lane.b32.xlu0 %v2167_v56, %s3109_s16 }
0x289d   :  { %v2170_v59 = vpop.permute.xlu0 %2169 }
0x289e   :  { %v2172_v60 = vadd.f32 %v2170_v59, %v2162_v58 }
0x28a0   :  { %3018 = vtanh.f32 %v2172_v60  ;;  %v2267_v19 = vrot.slane %v2172_v60, 6 }
0x28aa   :  { %v3019_v61 = vpop.eup %3018 }
0x28ab   :  { %2175 = vrot.lane.b32.xlu1 %v3019_v61, %s3108_s0 }
0x291d   :  { %v2176_v62 = vpop.permute.xlu1 %2175 }
0x291e   :  { %v2178_v63 = vmul.f32 %v3017_v53, %v2176_v62 }
0x2920   :  { %v2180_v50 = vrot.slane %v2178_v63, 4  ;;  %v2290_v2 = vsel %vm251_vm4, %v2289_v1, %v2178_v63 }
0x2922   :  { %2181 = vrot.lane.b32.xlu0 %v2180_v50, %s3109_s16 }
0x2994   :  { %v2182_v5 = vpop.permute.xlu0 %2181 }
0x2995   :  { %2759 = vmatmul.mubr.msk.f32.vlgmr.msra.gmra.mrb[20].mxu1 %vm341_vm6, %v2182_v5 }
0x2a68   :  { %v2251_v6 = vpop.f32.mrb[20].mxu1 }
0x2a69   :  { %v2256_v8 = vrot.slane %v2251_v6, 2  ;;  %v2760_v9 = vpop.f32.mrb[21].mxu1 }
0x2a6b   :  { %v2258_v32 = vadd.f32 %v2256_v8, %v3451_v48 }
0x2a6d   :  { %3020 = vtanh.f32 %v2258_v32  ;;  %v2439_v13 = vmul.f32 -1.442695, %v2258_v32 }
0x2a6f   :  { %3022 = vpow2.f32 %v2439_v13 }
0x2a77   :  { %v3021_v10 = vpop.eup %3020 }
0x2a78   :  { %2271 = vrot.lane.b32.xlu1 %v3021_v10, %s3108_s0 }
0x2a79   :  { %v3023_v14 = vpop.eup %3022 }
0x2a7a   :  { %v2262_v15 = vadd.f32 1.0, %v3023_v14 }
0x2a7c   :  { %3024 = vrcp.f32 %v2262_v15 }
0x2a86   :  { %v3025_v17 = vpop.eup %3024 }
0x2a87   :  { %v2269_v55 = vmul.f32 %v3025_v17, %v2267_v19 }
0x2aea   :  { %v2272_v18 = vpop.permute.xlu1 %2271 }
0x2aeb   :  { %v2274_v3 = vmul.f32 %v3025_v17, %v2272_v18 }
0x2aed   :  { %2276 = vrot.lane.b32.xlu0 %v2274_v3, %s3109_s16 }
0x2af1   :  { %2305 = vrot.lane.b32.xlu0 %v3502_v7, %s3109_s16  ;;  %v2880_v7 = vpack.c.bf16 %v2293_v23, %v2292_v12 }
0x2af3   :  { %2881 = vmatprep.subr.bf16.mxu0 %v2880_v7 }
0x2af4   :  { %2883 = vmatpush3.bf16.msra.mxu0 %v2880_v7 }
0x2af5   :  { %2885 = vmatprep.subr.bf16.mxu0 %v2884_v26 }
0x2af8   :  { %2887 = vmatpush3.bf16.msra.mxu0 %v2884_v26 }
0x2b5f   :  { %v2277_v48 = vpop.permute.xlu0 %2276 }
0x2b60   :  { %v2279_v20 = vadd.f32 %v2277_v48, %v2269_v55 }
0x2b62   :  { %3026 = vtanh.f32 %v2279_v20 }
0x2b63   :  { %v2306_v21 = vpop.permute.xlu0 %2305 }
0x2b64   :  { %2769 = vmatprep.mubr.msk.f32.mxu0 %vm341_vm6, %v2306_v21 }
0x2b6c   :  { %v3027_v16 = vpop.eup %3026 }
0x2b6d   :  { %2282 = vrot.lane.b32.xlu1 %v3027_v16, %s3108_s0 }
0x2bdf   :  { %v2283_v27 = vpop.permute.xlu1 %2282 }
0x2be0   :  { %v2285_v28 = vmul.f32 %v3025_v17, %v2283_v27 }
0x2be2   :  { %v2291_v29 = vsel %vm253_vm5, %v2290_v2, %v2285_v28 }
0x2be3   :  { %2307 = vrot.lane.b32.xlu1 %v2291_v29, %s3109_s16 }
0x2c55   :  { %v2308_v30 = vpop.permute.xlu1 %2307 }
0x2c56   :  { %2770 = vmatmul.mubr.msk.f32.vlgmr.msra.gmra.mrb[22].mxu0 %vm341_vm6, %v2308_v30 }
0x2d29   :  { %v2771_v34 = vpop.f32.mrb[22].mxu0 }
0x2d2a   :  { %v2385_v22 = vadd.f32 %v2771_v34, %v2440_v31  ;;  %v2379_v35 = vpop.f32.mrb[23].mxu0 }
0x2d2b   :  { %v2380_v0 = vadd.f32 %v2440_v31, %v2379_v35 }
0x2d2c   :  { %2389 = vst.msk [vmem:[%s3584_s11 + $0x8] sm:$0xff] %vm87_vm1, %v2385_v22 }
0x2d2d   :  { %2388 = vst.msk [vmem:[%s3584_s11] sm:$0xff] %vm87_vm1, %v2380_v0 }
0x2d2e   :  { %2394 = vsyncpa [#allocation3], 1 }
0x2d2f   :  { %2395 = vsyncpa [#allocation5], 1 }

</bundles_post_ra>
